<compile_context>
chip_gen: v5e
topology: v5e:2x2
jax: 0.10.0
libtpu: 0.0.40
codegen_flags: <defaults>
</compile_context>

<pallas_src>
import functools

import jax
import jax.numpy as jnp
import numpy as np
from jax import lax
from jax.experimental import pallas as pl
from jax.experimental.pallas import tpu as pltpu

NEG_INF = jnp.float32(-1e9)
THRESHOLD_CF = 1.0


def _vmem_limit_bytes():
    """Generation-aware scoped-VMEM budget (v5e/v6e: 128 MiB physical, v7x: 64 MiB)."""
    try:
        cap = int(pltpu.get_tpu_info().vmem_capacity_bytes)
    except Exception:
        cap = 64 * 1024 * 1024
    return int(min(cap // 2, 64 * 1024 * 1024))


# ----------------------------------------------------------------------------
# Pallas kernel: one invocation == full decode loop for one batch block
# ----------------------------------------------------------------------------
def _pointer_decoder_kernel(sos_token, eos_token, teacher_forcing, *refs):
    if teacher_forcing:
        (encp_ref, amask_ref, pmask_ref, thr_ref, oh_ref,
         w0_ref, b0_ref, w1_ref, b1_ref, init_ref, tf_ref,
         out_ref, x0_sc, x1_sc, c0_sc, c1_sc) = refs
    else:
        (encp_ref, amask_ref, pmask_ref, thr_ref, oh_ref,
         w0_ref, b0_ref, w1_ref, b1_ref, init_ref,
         out_ref, x0_sc, x1_sc, c0_sc, c1_sc) = refs
        tf_ref = None

    BB, S, Vp = oh_ref.shape                 # batch block, seq, padded vocab (x128)
    H = c0_sc.shape[-1]
    Tm1 = out_ref.shape[0]                   # output_len - 1 decode steps

    vid = lax.broadcasted_iota(jnp.int32, (BB, Vp), 1)

    # ---- once per batch block: init recurrent state + SOS input one-hot ----
    init = init_ref[...]
    x0_sc[:, :Vp] = (vid == sos_token).astype(jnp.float32)    # onehot(current token)
    x0_sc[:, Vp:] = init                                       # h0
    x1_sc[:, :H] = init                                        # overwritten each step
    x1_sc[:, H:] = init                                        # h1
    c0_sc[...] = init
    c1_sc[...] = init

    @pl.loop(0, Tm1)
    def _decode_step(t):
        # ---- LSTM layer 0: one MXU matmul; the one-hot row selects emb[tok] @ w_ih0 ----
        g0 = jnp.dot(x0_sc[...], w0_ref[...],
                     preferred_element_type=jnp.float32) + b0_ref[...]
        sg0 = jax.nn.sigmoid(g0)             # full-width EUP pass (i/f/o lanes)
        tg0 = jnp.tanh(g0)                   # full-width EUP pass (g lanes)
        c0n = sg0[:, H:2 * H] * c0_sc[...] + sg0[:, :H] * tg0[:, 2 * H:3 * H]
        h0n = sg0[:, 3 * H:] * jnp.tanh(c0n)
        c0_sc[...] = c0n
        x0_sc[:, Vp:] = h0n                  # h0 carry lives inside the matmul operand
        x1_sc[:, :H] = h0n

        # TODO(synk): inter-layer rnn_dropout / output nn.Dropout are identity (eval).

        # ---- LSTM layer 1: single merged [BB,2H]@[2H,4H] matmul ----
        g1 = jnp.dot(x1_sc[...], w1_ref[...],
                     preferred_element_type=jnp.float32) + b1_ref[...]
        sg1 = jax.nn.sigmoid(g1)
        tg1 = jnp.tanh(g1)
        c1n = sg1[:, H:2 * H] * c1_sc[...] + sg1[:, :H] * tg1[:, 2 * H:3 * H]
        h1n = sg1[:, 3 * H:] * jnp.tanh(c1n)
        c1_sc[...] = c1n
        x1_sc[:, H:] = h1n

        # ---- Luong attention: batched MXU mat-vec against pre-projected encoder ----
        h1q = jnp.reshape(h1n, (BB, 1, H))
        score = jnp.einsum('bqh,bsh->bqs', h1q, encp_ref[...],
                           preferred_element_type=jnp.float32) + amask_ref[...]  # [BB,1,S]
        score = score - jnp.max(score, axis=-1, keepdims=True)
        e = jnp.exp(score)
        sum_e = jnp.sum(e, axis=-1, keepdims=True)
        # threshold in un-normalised space (exact: p >= thr  <=>  e >= thr*sum_e)
        keep = e >= thr_ref[...] * sum_e
        # EUP approximate reciprocal + one Newton step (restores ~f32 accuracy)
        inv = pl.reciprocal(sum_e, approx=True)
        inv = inv * (2.0 - sum_e * inv)
        p = jnp.where(keep, e * inv, 0.0) * pmask_ref[...]                        # [BB,1,S]

        # ---- pointer -> vocab scatter: batched MXU matmul with the hoisted one-hot ----
        vocab = jnp.einsum('bqs,bsv->bqv', p, oh_ref[...],
                           preferred_element_type=jnp.float32)                    # [BB,1,Vp]
        vocab = jnp.reshape(vocab, (BB, Vp))
        eos_col = 1.0 - jnp.sum(p, axis=-1)                                       # [BB,1]
        vocab = jnp.where(vid == eos_token, eos_col, vocab)

        out_ref[t] = vocab                   # lane-dense [BB, Vp] store

        # ---- next input token (one-hot row of the merged layer-0 operand) ----
        if teacher_forcing:
            nxt = tf_ref[t + 1]                                                   # [BB,1]
            x0_sc[:, :Vp] = (vid == nxt).astype(jnp.float32)
        else:
            # greedy argmax with first-max tie-break (matches torch/jnp argmax)
            vmax = jnp.max(vocab, axis=-1, keepdims=True)
            idx = jnp.min(jnp.where(vocab >= vmax, vid, Vp), axis=-1, keepdims=True)
            x0_sc[:, :Vp] = (vid == idx).astype(jnp.float32)


# ----------------------------------------------------------------------------
# Parameter init (deterministic, synthetic)
# ----------------------------------------------------------------------------
def init_params(key, V, E, H, pad_token):
    ks = jax.random.split(key, 8)
    s = 0.1
    emb = jax.random.normal(ks[0], (V, E), jnp.float32) * s
    emb = emb.at[pad_token].set(0.0)            # nn.Embedding padding_idx row is zero
    return dict(
        emb=emb,
        w_ih0=jax.random.normal(ks[1], (E, 4 * H), jnp.float32) * s,
        w_hh0=jax.random.normal(ks[2], (H, 4 * H), jnp.float32) * s,
        b0=jax.random.normal(ks[3], (1, 4 * H), jnp.float32) * s,    # b_ih + b_hh folded
        w_ih1=jax.random.normal(ks[4], (H, 4 * H), jnp.float32) * s,
        w_hh1=jax.random.normal(ks[5], (H, 4 * H), jnp.float32) * s,
        b1=jax.random.normal(ks[6], (1, 4 * H), jnp.float32) * s,
        w_attn=jax.random.normal(ks[7], (H, H), jnp.float32) * s,    # LuongAttention W^T
    )


# ----------------------------------------------------------------------------
# Pallas-backed forward (mirrors PointerDecoder.forward)
# ----------------------------------------------------------------------------
def pointer_decoder_forward(params, encoder_states, pad_valid, pointer_mask, token_ids,
                            output_len, sos_token, eos_token, n_tokens,
                            target_sequence=None, batch_block=None):
    B, S, H = encoder_states.shape
    V = n_tokens
    Hg = 4 * H
    Vp = ((V + 127) // 128) * 128                     # lane-dense vocab
    T = output_len

    sos_row = jnp.zeros((1, B, V), jnp.float32).at[0, :, sos_token].set(1.0)
    if T <= 1:
        return sos_row[:T]

    # batch block: fill the MXU M-dim when the real batch allows it (multiple of 8)
    B8 = ((B + 7) // 8) * 8
    if batch_block is None:
        batch_block = 256
    BB = max(8, min(((batch_block + 7) // 8) * 8, B8))
    Bp = ((B + BB - 1) // BB) * BB
    nb = Bp // BB

    def pad_b(x, fill=0):
        if Bp == x.shape[0]:
            return x
        widths = [(0, Bp - x.shape[0])] + [(0, 0)] * (x.ndim - 1)
        return jnp.pad(x, widths, constant_values=fill)

    enc_p = pad_b(encoder_states.astype(jnp.float32))
    pv_p = pad_b(pad_valid)
    pm_p = pad_b(pointer_mask)
    tok_p = pad_b(token_ids).astype(jnp.int32)

    # attention mask: 0 at valid pointer positions, -1e9 elsewhere (pads + non-pointers)
    amask = jnp.where(pm_p, 0.0, NEG_INF).astype(jnp.float32)[:, None, :]        # [Bp,1,S]
    pmask = pm_p.astype(jnp.float32)[:, None, :]                                 # [Bp,1,S]
    psum = jnp.sum(pm_p.astype(jnp.float32), axis=1, keepdims=True)
    # thr = 1/(cf * #pointers); any finite value > 1 zeroes all probabilities for
    # empty rows, exactly like the PyTorch inf threshold.
    thr = jnp.where(psum > 0, 1.0 / (THRESHOLD_CF * psum), 2.0)
    thr = thr.astype(jnp.float32)[:, :, None]                                    # [Bp,1,1]

    # _init_lstm_state: mean over padding-valid positions (padded rows guarded to 0)
    seg = jnp.maximum(jnp.sum(pv_p.astype(jnp.float32), axis=1, keepdims=True), 1.0)
    init_state = (jnp.sum(enc_p, axis=1) / seg).astype(jnp.float32)              # [Bp,H]

    # hoisted attention projection: <enc, W h> == <enc W^T, h>
    enc_proj = jnp.einsum("bsk,jk->bsj", enc_p, params["w_attn"]).astype(jnp.float32)

    # hoisted pointer->vocab scatter one-hot (step-invariant, depends only on tokens)
    ptr_onehot = (tok_p[:, :, None]
                  == jnp.arange(Vp, dtype=jnp.int32)[None, None, :]).astype(jnp.float32)

    # merged layer-0 weight: rows [0:Vp) = emb_table @ w_ih0 (embedding + input proj),
    # rows [Vp:Vp+H) = w_hh0.  Padded vocab rows are zero (never selected).
    emb_gates = params["emb"] @ params["w_ih0"]                       # [V, 4H]
    emb_gates = jnp.pad(emb_gates, ((0, Vp - V), (0, 0)))
    w0 = jnp.concatenate([emb_gates, params["w_hh0"]], axis=0).astype(jnp.float32)
    # merged layer-1 weight: rows [0:H) = w_ih1, rows [H:2H) = w_hh1
    w1 = jnp.concatenate([params["w_ih1"], params["w_hh1"]], axis=0).astype(jnp.float32)

    teacher_forcing = target_sequence is not None

    kernel = functools.partial(_pointer_decoder_kernel,
                               int(sos_token), int(eos_token), bool(teacher_forcing))

    bmap2 = lambda bb: (bb, 0)            # batch-blocked
    bmap3 = lambda bb: (bb, 0, 0)
    cmap2 = lambda bb: (0, 0)             # fully invariant (weights)

    in_specs = [
        pl.BlockSpec((BB, S, H), bmap3),                         # enc_proj
        pl.BlockSpec((BB, 1, S), bmap3),                         # attention mask
        pl.BlockSpec((BB, 1, S), bmap3),                         # pointer mask
        pl.BlockSpec((BB, 1, 1), bmap3),                         # threshold
        pl.BlockSpec((BB, S, Vp), bmap3),                        # pointer->vocab one-hot
        pl.BlockSpec((Vp + H, Hg), cmap2),                       # merged W0
        pl.BlockSpec((1, Hg), cmap2),                            # b0
        pl.BlockSpec((2 * H, Hg), cmap2),                        # merged W1
        pl.BlockSpec((1, Hg), cmap2),                            # b1
        pl.BlockSpec((BB, H), bmap2),                            # initial h/c state
    ]
    args = [enc_proj, amask, pmask, thr, ptr_onehot, w0, params["b0"],
            w1, params["b1"], init_state]
    if teacher_forcing:
        tf_tok = jnp.pad(target_sequence.astype(jnp.int32), ((0, 0), (0, Bp - B)),
                         constant_values=sos_token)[:, :, None]  # [T, Bp, 1]
        in_specs.append(pl.BlockSpec((T, BB, 1), lambda bb: (0, bb, 0)))
        args.append(tf_tok)

    # TODO(synk): for very long output_len, tile the (T-1, BB, Vp) output block over T.
    out = pl.pallas_call(
        kernel,
        out_shape=jax.ShapeDtypeStruct((T - 1, Bp, Vp), jnp.float32),
        grid_spec=pltpu.PrefetchScalarGridSpec(
            num_scalar_prefetch=0,
            grid=(nb,),
            in_specs=in_specs,
            out_specs=pl.BlockSpec((T - 1, BB, Vp), lambda bb: (0, bb, 0)),
            scratch_shapes=[
                pltpu.VMEM((BB, Vp + H), jnp.float32),   # x0 = [onehot(token) | h0]
                pltpu.VMEM((BB, 2 * H), jnp.float32),    # x1 = [h0_new | h1]
                pltpu.VMEM((BB, H), jnp.float32),        # c0
                pltpu.VMEM((BB, H), jnp.float32),        # c1
            ],
        ),
        compiler_params=pltpu.CompilerParams(
            dimension_semantics=("parallel",),
            vmem_limit_bytes=_vmem_limit_bytes()),
    )(*args)

    vocabs = out[:, :B, :V]                                            # strip padding
    return jnp.concatenate([sos_row, vocabs], axis=0)                  # [output_len, B, V]


# ----------------------------------------------------------------------------
# Pure-JAX reference (module-faithful, used for validation)
# ----------------------------------------------------------------------------
def pointer_decoder_reference(params, encoder_states, pad_valid, pointer_mask, token_ids,
                              output_len, sos_token, eos_token, n_tokens,
                              target_sequence=None):
    B, S, H = encoder_states.shape
    V = n_tokens
    amask = jnp.where(pointer_mask, 0.0, NEG_INF).astype(jnp.float32)
    pmask = pointer_mask.astype(jnp.float32)
    thr = 1.0 / (THRESHOLD_CF * jnp.sum(pmask, axis=1, keepdims=True))
    seg = jnp.sum(pad_valid.astype(jnp.float32), axis=1, keepdims=True)
    init = jnp.sum(encoder_states, axis=1) / seg
    rows = jnp.arange(B)[:, None]

    def cell(x, h, c, w_ih, w_hh, b):
        g = x @ w_ih + h @ w_hh + b
        i = jax.nn.sigmoid(g[:, :H])
        f = jax.nn.sigmoid(g[:, H:2 * H])
        gg = jnp.tanh(g[:, 2 * H:3 * H])
        o = jax.nn.sigmoid(g[:, 3 * H:])
        c_new = f * c + i * gg
        return o * jnp.tanh(c_new), c_new

    def step(carry, st):
        h0, c0, h1, c1, cur = carry
        x = params["emb"][cur]
        h0n, c0n = cell(x, h0, c0, params["w_ih0"], params["w_hh0"], params["b0"])
        h1n, c1n = cell(h0n, h1, c1, params["w_ih1"], params["w_hh1"], params["b1"])
        att = h1n @ params["w_attn"]
        score = jnp.einsum("bsh,bh->bs", encoder_states, att) + amask
        p = jax.nn.softmax(score, axis=-1)
        p = jnp.where(p < thr, 0.0, p) * pmask
        vocab = jnp.zeros((B, V), jnp.float32).at[rows, token_ids].add(p)
        vocab = vocab.at[:, eos_token].set(1.0 - jnp.sum(p, axis=-1))
        if target_sequence is not None:
            nxt = target_sequence[st]
        else:
            nxt = jnp.argmax(vocab, axis=-1).astype(jnp.int32)
        return (h0n, c0n, h1n, c1n, nxt), vocab

    cur0 = jnp.full((B,), sos_token, jnp.int32)
    _, vocabs = lax.scan(step, (init, init, init, init, cur0),
                         jnp.arange(1, output_len))
    out0 = jnp.zeros((1, B, V), jnp.float32).at[0, :, sos_token].set(1.0)
    return jnp.concatenate([out0, vocabs], axis=0)


# ----------------------------------------------------------------------------
if __name__ == "__main__":
    B, S, H, E = 2, 8, 32, 16
    V = 12                                   # n_tokens
    SOS, EOS, PAD = 0, 1, 2
    IGNORE_IDS = jnp.array([3, 4], jnp.int32)
    OUTPUT_LEN = 6

    key = jax.random.PRNGKey(0)
    k_enc, k_tok, k_leaf, k_par, k_tgt = jax.random.split(key, 5)

    params = init_params(k_par, V, E, H, PAD)

    # synthetic "batched trees": per-example node counts, leaves, node tokens
    num_nodes = jnp.array([8, 5], jnp.int32)
    pos = jnp.arange(S)[None, :]
    pad_valid = pos < num_nodes[:, None]                          # [B, S] bool

    enc = jax.random.normal(k_enc, (B, S, H), jnp.float32)
    enc = enc * pad_valid[:, :, None].astype(jnp.float32)         # pads zeroed

    token_ids = jax.random.randint(k_tok, (B, S), 3, V).astype(jnp.int32)
    leaves = jax.random.bernoulli(k_leaf, 0.7, (B, S))
    bad = (token_ids[:, :, None] == IGNORE_IDS[None, None, :]).any(-1)
    pointer_mask = leaves & (~bad) & pad_valid
    # guarantee at least one valid pointer per tree (position 0, non-ignored token)
    token_ids = token_ids.at[:, 0].set(5)
    pointer_mask = pointer_mask.at[:, 0].set(True)

    target_sequence = jax.random.randint(k_tgt, (OUTPUT_LEN, B), 0, V).astype(jnp.int32)

    # teacher-forced run: fused Pallas kernel vs pure-JAX reference
    out_kernel = pointer_decoder_forward(params, enc, pad_valid, pointer_mask, token_ids,
                                         OUTPUT_LEN, SOS, EOS, V,
                                         target_sequence=target_sequence)
    jax.block_until_ready(out_kernel)
    out_ref = pointer_decoder_reference(params, enc, pad_valid, pointer_mask, token_ids,
                                        OUTPUT_LEN, SOS, EOS, V,
                                        target_sequence=target_sequence)
    # tolerance covers the EUP approximate-reciprocal (+1 Newton step) softmax normaliser
    np.testing.assert_allclose(np.asarray(out_kernel), np.asarray(out_ref),
                               rtol=1e-3, atol=1e-3)

    # greedy (target_sequence=None) run with in-kernel argmax + embedding one-hot
    out_greedy = pointer_decoder_forward(params, enc, pad_valid, pointer_mask, token_ids,
                                         OUTPUT_LEN, SOS, EOS, V, target_sequence=None)
    jax.block_until_ready(out_greedy)
    assert out_greedy.shape == (OUTPUT_LEN, B, V)
    assert bool(jnp.all(jnp.isfinite(out_greedy)))

    print("KERNEL_OK")
</pallas_src>

<mosaic_0001>
module attributes {stable_mosaic.version = 11 : i64} {
  func.func @_pointer_decoder_kernel(%arg0: i32, %arg1: memref<8x8x32xf32, #tpu.memory_space<vmem>>, %arg2: memref<8x1x8xf32, #tpu.memory_space<vmem>>, %arg3: memref<8x1x8xf32, #tpu.memory_space<vmem>>, %arg4: memref<8x1x1xf32, #tpu.memory_space<vmem>>, %arg5: memref<8x8x128xf32, #tpu.memory_space<vmem>>, %arg6: memref<160x128xf32, #tpu.memory_space<vmem>>, %arg7: memref<1x128xf32, #tpu.memory_space<vmem>>, %arg8: memref<64x128xf32, #tpu.memory_space<vmem>>, %arg9: memref<1x128xf32, #tpu.memory_space<vmem>>, %arg10: memref<8x32xf32, #tpu.memory_space<vmem>>, %arg11: memref<6x8x1xi32, #tpu.memory_space<vmem>>, %arg12: memref<5x8x128xf32, #tpu.memory_space<vmem>>, %arg13: memref<8x160xf32, #tpu.memory_space<vmem>>, %arg14: memref<8x64xf32, #tpu.memory_space<vmem>>, %arg15: memref<8x32xf32, #tpu.memory_space<vmem>>, %arg16: memref<8x32xf32, #tpu.memory_space<vmem>>) attributes {dimension_semantics = [#tpu.dimension_semantics<parallel>], iteration_bounds = array<i64: 1>, scalar_prefetch = 0 : i64, scratch_operands = 4 : i64, tpu.core_type = #tpu.core_type<tc>, window_params = [{transform_indices = @transform_0, window_bounds = array<i64: 8, 8, 32>}, {transform_indices = @transform_1, window_bounds = array<i64: 8, 1, 8>}, {transform_indices = @transform_2, window_bounds = array<i64: 8, 1, 8>}, {transform_indices = @transform_3, window_bounds = array<i64: 8, 1, 1>}, {transform_indices = @transform_4, window_bounds = array<i64: 8, 8, 128>}, {pipeline_mode = #tpu.pipeline_mode<synchronous>, transform_indices = @transform_5, window_bounds = array<i64: 160, 128>}, {pipeline_mode = #tpu.pipeline_mode<synchronous>, transform_indices = @transform_6, window_bounds = array<i64: 1, 128>}, {pipeline_mode = #tpu.pipeline_mode<synchronous>, transform_indices = @transform_7, window_bounds = array<i64: 64, 128>}, {pipeline_mode = #tpu.pipeline_mode<synchronous>, transform_indices = @transform_8, window_bounds = array<i64: 1, 128>}, {transform_indices = @transform_9, window_bounds = array<i64: 8, 32>}, {transform_indices = @transform_10, window_bounds = array<i64: 6, 8, 1>}, {transform_indices = @transform_11, window_bounds = array<i64: 5, 8, 128>}]} {
    %0 = tpu.iota {dimensions = array<i32: 1>} : vector<8x128xi32>
    %c0 = arith.constant 0 : index
    %c0_0 = arith.constant 0 : index
    %1 = vector.load %arg10[%c0, %c0_0] : memref<8x32xf32, #tpu.memory_space<vmem>>, vector<8x32xf32>
    %c0_i32 = arith.constant 0 : i32
    %2 = vector.broadcast %c0_i32 : i32 to vector<8x128xi32>
    %3 = arith.cmpi eq, %0, %2 : vector<8x128xi32>
    %4 = arith.extui %3 : vector<8x128xi1> to vector<8x128xi32>
    %5 = arith.sitofp %4 : vector<8x128xi32> to vector<8x128xf32>
    %c0_1 = arith.constant 0 : index
    %c0_2 = arith.constant 0 : index
    %6 = vector.load %arg13[%c0_1, %c0_2] : memref<8x160xf32, #tpu.memory_space<vmem>>, vector<8x128xf32>
    tpu.vector_store %arg13[%c0_1, %c0_2], %5 {strides = array<i32>} : memref<8x160xf32, #tpu.memory_space<vmem>>, vector<8x128xf32>,
    %c0_3 = arith.constant 0 : index
    %c128 = arith.constant 128 : index
    %7 = vector.load %arg13[%c0_3, %c128] : memref<8x160xf32, #tpu.memory_space<vmem>>, vector<8x32xf32>
    tpu.vector_store %arg13[%c0_3, %c128], %1 {strides = array<i32>} : memref<8x160xf32, #tpu.memory_space<vmem>>, vector<8x32xf32>,
    %c0_4 = arith.constant 0 : index
    %c0_5 = arith.constant 0 : index
    %8 = vector.load %arg14[%c0_4, %c0_5] : memref<8x64xf32, #tpu.memory_space<vmem>>, vector<8x32xf32>
    tpu.vector_store %arg14[%c0_4, %c0_5], %1 {strides = array<i32>} : memref<8x64xf32, #tpu.memory_space<vmem>>, vector<8x32xf32>,
    %c0_6 = arith.constant 0 : index
    %c32 = arith.constant 32 : index
    %9 = vector.load %arg14[%c0_6, %c32] : memref<8x64xf32, #tpu.memory_space<vmem>>, vector<8x32xf32>
    tpu.vector_store %arg14[%c0_6, %c32], %1 {strides = array<i32>} : memref<8x64xf32, #tpu.memory_space<vmem>>, vector<8x32xf32>,
    %c0_7 = arith.constant 0 : index
    %c0_8 = arith.constant 0 : index
    %10 = vector.load %arg15[%c0_7, %c0_8] : memref<8x32xf32, #tpu.memory_space<vmem>>, vector<8x32xf32>
    tpu.vector_store %arg15[%c0_7, %c0_8], %1 {strides = array<i32>} : memref<8x32xf32, #tpu.memory_space<vmem>>, vector<8x32xf32>,
    %c0_9 = arith.constant 0 : index
    %c0_10 = arith.constant 0 : index
    %11 = vector.load %arg16[%c0_9, %c0_10] : memref<8x32xf32, #tpu.memory_space<vmem>>, vector<8x32xf32>
    tpu.vector_store %arg16[%c0_9, %c0_10], %1 {strides = array<i32>} : memref<8x32xf32, #tpu.memory_space<vmem>>, vector<8x32xf32>,
    %c0_i32_11 = arith.constant 0 : i32
    %c5_i32 = arith.constant 5 : i32
    %12 = arith.addi %c0_i32_11, %c5_i32 : i32
    %c1_i32 = arith.constant 1 : i32
    scf.for %arg17 = %c0_i32_11 to %12 step %c1_i32  : i32 {
      %c1_i32_13 = arith.constant 1 : i32
      %13 = arith.muli %arg17, %c1_i32_13 : i32
      %c0_i32_14 = arith.constant 0 : i32
      %14 = arith.addi %c0_i32_14, %13 : i32
      %c0_15 = arith.constant 0 : index
      %c0_16 = arith.constant 0 : index
      %15 = vector.load %arg13[%c0_15, %c0_16] : memref<8x160xf32, #tpu.memory_space<vmem>>, vector<8x160xf32>
      %c0_17 = arith.constant 0 : index
      %c0_18 = arith.constant 0 : index
      %16 = vector.load %arg6[%c0_17, %c0_18] : memref<160x128xf32, #tpu.memory_space<vmem>>, vector<160x128xf32>
      %cst = arith.constant dense<0.000000e+00> : vector<8x128xf32>
      %17 = tpu.matmul %15, %16, %cst {dimension_numbers = #tpu.dot_dimension_numbers<[1], [0], [0], [1], [0, 0, 1, 1], [], []>} : vector<8x160xf32>, vector<160x128xf32>, vector<8x128xf32> -> vector<8x128xf32>
      %c0_19 = arith.constant 0 : index
      %c0_20 = arith.constant 0 : index
      %18 = vector.load %arg7[%c0_19, %c0_20] : memref<1x128xf32, #tpu.memory_space<vmem>>, vector<1x128xf32>
      %19 = vector.broadcast %18 : vector<1x128xf32> to vector<8x128xf32>
      %20 = arith.addf %17, %19 : vector<8x128xf32>
      %21 = arith.negf %20 : vector<8x128xf32>
      %22 = math.exp %21 : vector<8x128xf32>
      %cst_21 = arith.constant 1.000000e+00 : f32
      %23 = vector.broadcast %cst_21 : f32 to vector<8x128xf32>
      %24 = arith.addf %23, %22 : vector<8x128xf32>
      %25 = arith.divf %23, %24 : vector<8x128xf32>
      %26 = math.tanh %20 : vector<8x128xf32>
      %27 = vector.extract_strided_slice %25 {offsets = [0, 32], sizes = [8, 32], strides = [1, 1]} : vector<8x128xf32> to vector<8x32xf32>
      %c0_22 = arith.constant 0 : index
      %c0_23 = arith.constant 0 : index
      %28 = vector.load %arg15[%c0_22, %c0_23] : memref<8x32xf32, #tpu.memory_space<vmem>>, vector<8x32xf32>
      %29 = arith.mulf %27, %28 : vector<8x32xf32>
      %30 = vector.extract_strided_slice %25 {offsets = [0, 0], sizes = [8, 32], strides = [1, 1]} : vector<8x128xf32> to vector<8x32xf32>
      %31 = vector.extract_strided_slice %26 {offsets = [0, 64], sizes = [8, 32], strides = [1, 1]} : vector<8x128xf32> to vector<8x32xf32>
      %32 = arith.mulf %30, %31 : vector<8x32xf32>
      %33 = arith.addf %29, %32 : vector<8x32xf32>
      %34 = vector.extract_strided_slice %25 {offsets = [0, 96], sizes = [8, 32], strides = [1, 1]} : vector<8x128xf32> to vector<8x32xf32>
      %35 = math.tanh %33 : vector<8x32xf32>
      %36 = arith.mulf %34, %35 : vector<8x32xf32>
      %c0_24 = arith.constant 0 : index
      %c0_25 = arith.constant 0 : index
      %37 = vector.load %arg15[%c0_24, %c0_25] : memref<8x32xf32, #tpu.memory_space<vmem>>, vector<8x32xf32>
      tpu.vector_store %arg15[%c0_24, %c0_25], %33 {strides = array<i32>} : memref<8x32xf32, #tpu.memory_space<vmem>>, vector<8x32xf32>,
      %c0_26 = arith.constant 0 : index
      %c128_27 = arith.constant 128 : index
      %38 = vector.load %arg13[%c0_26, %c128_27] : memref<8x160xf32, #tpu.memory_space<vmem>>, vector<8x32xf32>
      tpu.vector_store %arg13[%c0_26, %c128_27], %36 {strides = array<i32>} : memref<8x160xf32, #tpu.memory_space<vmem>>, vector<8x32xf32>,
      %c0_28 = arith.constant 0 : index
      %c0_29 = arith.constant 0 : index
      %39 = vector.load %arg14[%c0_28, %c0_29] : memref<8x64xf32, #tpu.memory_space<vmem>>, vector<8x32xf32>
      tpu.vector_store %arg14[%c0_28, %c0_29], %36 {strides = array<i32>} : memref<8x64xf32, #tpu.memory_space<vmem>>, vector<8x32xf32>,
      %c0_30 = arith.constant 0 : index
      %c0_31 = arith.constant 0 : index
      %40 = vector.load %arg14[%c0_30, %c0_31] : memref<8x64xf32, #tpu.memory_space<vmem>>, vector<8x64xf32>
      %c0_32 = arith.constant 0 : index
      %c0_33 = arith.constant 0 : index
      %41 = vector.load %arg8[%c0_32, %c0_33] : memref<64x128xf32, #tpu.memory_space<vmem>>, vector<64x128xf32>
      %cst_34 = arith.constant dense<0.000000e+00> : vector<8x128xf32>
      %42 = tpu.matmul %40, %41, %cst_34 {dimension_numbers = #tpu.dot_dimension_numbers<[1], [0], [0], [1], [0, 0, 1, 1], [], []>} : vector<8x64xf32>, vector<64x128xf32>, vector<8x128xf32> -> vector<8x128xf32>
      %c0_35 = arith.constant 0 : index
      %c0_36 = arith.constant 0 : index
      %43 = vector.load %arg9[%c0_35, %c0_36] : memref<1x128xf32, #tpu.memory_space<vmem>>, vector<1x128xf32>
      %44 = vector.broadcast %43 : vector<1x128xf32> to vector<8x128xf32>
      %45 = arith.addf %42, %44 : vector<8x128xf32>
      %46 = arith.negf %45 : vector<8x128xf32>
      %47 = math.exp %46 : vector<8x128xf32>
      %cst_37 = arith.constant 1.000000e+00 : f32
      %48 = vector.broadcast %cst_37 : f32 to vector<8x128xf32>
      %49 = arith.addf %48, %47 : vector<8x128xf32>
      %50 = arith.divf %48, %49 : vector<8x128xf32>
      %51 = math.tanh %45 : vector<8x128xf32>
      %52 = vector.extract_strided_slice %50 {offsets = [0, 32], sizes = [8, 32], strides = [1, 1]} : vector<8x128xf32> to vector<8x32xf32>
      %c0_38 = arith.constant 0 : index
      %c0_39 = arith.constant 0 : index
      %53 = vector.load %arg16[%c0_38, %c0_39] : memref<8x32xf32, #tpu.memory_space<vmem>>, vector<8x32xf32>
      %54 = arith.mulf %52, %53 : vector<8x32xf32>
      %55 = vector.extract_strided_slice %50 {offsets = [0, 0], sizes = [8, 32], strides = [1, 1]} : vector<8x128xf32> to vector<8x32xf32>
      %56 = vector.extract_strided_slice %51 {offsets = [0, 64], sizes = [8, 32], strides = [1, 1]} : vector<8x128xf32> to vector<8x32xf32>
      %57 = arith.mulf %55, %56 : vector<8x32xf32>
      %58 = arith.addf %54, %57 : vector<8x32xf32>
      %59 = vector.extract_strided_slice %50 {offsets = [0, 96], sizes = [8, 32], strides = [1, 1]} : vector<8x128xf32> to vector<8x32xf32>
      %60 = math.tanh %58 : vector<8x32xf32>
      %61 = arith.mulf %59, %60 : vector<8x32xf32>
      %c0_40 = arith.constant 0 : index
      %c0_41 = arith.constant 0 : index
      %62 = vector.load %arg16[%c0_40, %c0_41] : memref<8x32xf32, #tpu.memory_space<vmem>>, vector<8x32xf32>
      tpu.vector_store %arg16[%c0_40, %c0_41], %58 {strides = array<i32>} : memref<8x32xf32, #tpu.memory_space<vmem>>, vector<8x32xf32>,
      %c0_42 = arith.constant 0 : index
      %c32_43 = arith.constant 32 : index
      %63 = vector.load %arg14[%c0_42, %c32_43] : memref<8x64xf32, #tpu.memory_space<vmem>>, vector<8x32xf32>
      tpu.vector_store %arg14[%c0_42, %c32_43], %61 {strides = array<i32>} : memref<8x64xf32, #tpu.memory_space<vmem>>, vector<8x32xf32>,
      %64 = vector.shape_cast %61 : vector<8x32xf32> to vector<8x1x32xf32>
      %c0_44 = arith.constant 0 : index
      %c0_45 = arith.constant 0 : index
      %c0_46 = arith.constant 0 : index
      %65 = vector.load %arg1[%c0_44, %c0_45, %c0_46] : memref<8x8x32xf32, #tpu.memory_space<vmem>>, vector<8x8x32xf32>
      "tpu.trace_start"() <{level = 10 : i32, message = "bqh,bsh->bqs"}> : () -> ()
      %cst_47 = arith.constant dense<0.000000e+00> : vector<8x1x8xf32>
      %66 = tpu.matmul %64, %65, %cst_47 {dimension_numbers = #tpu.dot_dimension_numbers<[2], [2], [1], [1], [0, 0, 0, 1, 1, 1], [0], [0]>} : vector<8x1x32xf32>, vector<8x8x32xf32>, vector<8x1x8xf32> -> vector<8x1x8xf32>
      "tpu.trace_stop"() : () -> ()
      %c0_48 = arith.constant 0 : index
      %c0_49 = arith.constant 0 : index
      %c0_50 = arith.constant 0 : index
      %67 = vector.load %arg2[%c0_48, %c0_49, %c0_50] : memref<8x1x8xf32, #tpu.memory_space<vmem>>, vector<8x1x8xf32>
      %68 = arith.addf %66, %67 : vector<8x1x8xf32>
      %cst_51 = arith.constant dense<0xFF800000> : vector<8x1xf32>
      %69 = vector.multi_reduction <maximumf>, %68, %cst_51 [2] : vector<8x1x8xf32> to vector<8x1xf32>
      %70 = vector.shape_cast %69 : vector<8x1xf32> to vector<8x1x1xf32>
      %71 = vector.broadcast %70 : vector<8x1x1xf32> to vector<8x1x8xf32>
      %72 = arith.subf %68, %71 : vector<8x1x8xf32>
      %73 = math.exp %72 : vector<8x1x8xf32>
      %cst_52 = arith.constant dense<0.000000e+00> : vector<8x1xf32>
      %74 = vector.multi_reduction <add>, %73, %cst_52 [2] : vector<8x1x8xf32> to vector<8x1xf32>
      %75 = vector.shape_cast %74 : vector<8x1xf32> to vector<8x1x1xf32>
      %c0_53 = arith.constant 0 : index
      %c0_54 = arith.constant 0 : index
      %c0_55 = arith.constant 0 : index
      %76 = vector.load %arg4[%c0_53, %c0_54, %c0_55] : memref<8x1x1xf32, #tpu.memory_space<vmem>>, vector<8x1x1xf32>
      %77 = arith.mulf %76, %75 : vector<8x1x1xf32>
      %78 = vector.broadcast %77 : vector<8x1x1xf32> to vector<8x1x8xf32>
      %79 = arith.cmpf oge, %73, %78 : vector<8x1x8xf32>
      %80 = tpu.reciprocal %75 {approx = true} : vector<8x1x1xf32> -> vector<8x1x1xf32>
      %81 = arith.mulf %75, %80 : vector<8x1x1xf32>
      %cst_56 = arith.constant 2.000000e+00 : f32
      %82 = vector.broadcast %cst_56 : f32 to vector<8x1x1xf32>
      %83 = arith.subf %82, %81 : vector<8x1x1xf32>
      %84 = arith.mulf %80, %83 : vector<8x1x1xf32>
      %85 = vector.broadcast %84 : vector<8x1x1xf32> to vector<8x1x8xf32>
      %86 = arith.mulf %73, %85 : vector<8x1x8xf32>
      %cst_57 = arith.constant 0.000000e+00 : f32
      %87 = vector.broadcast %cst_57 : f32 to vector<8x1x8xf32>
      %88 = arith.select %79, %86, %87 : vector<8x1x8xi1>, vector<8x1x8xf32>
      %c0_58 = arith.constant 0 : index
      %c0_59 = arith.constant 0 : index
      %c0_60 = arith.constant 0 : index
      %89 = vector.load %arg3[%c0_58, %c0_59, %c0_60] : memref<8x1x8xf32, #tpu.memory_space<vmem>>, vector<8x1x8xf32>
      %90 = arith.mulf %88, %89 : vector<8x1x8xf32>
      %c0_61 = arith.constant 0 : index
      %c0_62 = arith.constant 0 : index
      %c0_63 = arith.constant 0 : index
      %91 = vector.load %arg5[%c0_61, %c0_62, %c0_63] : memref<8x8x128xf32, #tpu.memory_space<vmem>>, vector<8x8x128xf32>
      "tpu.trace_start"() <{level = 10 : i32, message = "bqs,bsv->bqv"}> : () -> ()
      %cst_64 = arith.constant dense<0.000000e+00> : vector<8x1x128xf32>
      %92 = tpu.matmul %90, %91, %cst_64 {dimension_numbers = #tpu.dot_dimension_numbers<[2], [1], [1], [2], [0, 0, 0, 1, 1, 2], [0], [0]>} : vector<8x1x8xf32>, vector<8x8x128xf32>, vector<8x1x128xf32> -> vector<8x1x128xf32>
      "tpu.trace_stop"() : () -> ()
      %93 = vector.shape_cast %92 : vector<8x1x128xf32> to vector<8x128xf32>
      %cst_65 = arith.constant dense<0.000000e+00> : vector<8x1xf32>
      %94 = vector.multi_reduction <add>, %90, %cst_65 [2] : vector<8x1x8xf32> to vector<8x1xf32>
      %cst_66 = arith.constant 1.000000e+00 : f32
      %95 = vector.broadcast %cst_66 : f32 to vector<8x1xf32>
      %96 = arith.subf %95, %94 : vector<8x1xf32>
      %c1_i32_67 = arith.constant 1 : i32
      %97 = vector.broadcast %c1_i32_67 : i32 to vector<8x128xi32>
      %98 = arith.cmpi eq, %0, %97 : vector<8x128xi32>
      %99 = vector.shape_cast %96 : vector<8x1xf32> to vector<8x1xf32>
      %100 = vector.broadcast %99 : vector<8x1xf32> to vector<8x128xf32>
      %101 = arith.select %98, %100, %93 : vector<8x128xi1>, vector<8x128xf32>
      %102 = arith.index_cast %14 : i32 to index
      %c0_68 = arith.constant 0 : index
      %c0_69 = arith.constant 0 : index
      %103 = vector.load %arg12[%102, %c0_68, %c0_69] : memref<5x8x128xf32, #tpu.memory_space<vmem>>, vector<1x8x128xf32>
      %104 = vector.shape_cast %103 : vector<1x8x128xf32> to vector<8x128xf32>
      %105 = vector.shape_cast %101 : vector<8x128xf32> to vector<1x8x128xf32>
      tpu.vector_store %arg12[%102, %c0_68, %c0_69], %105 {strides = array<i32>} : memref<5x8x128xf32, #tpu.memory_space<vmem>>, vector<1x8x128xf32>,
      %c1_i32_70 = arith.constant 1 : i32
      %106 = arith.addi %14, %c1_i32_70 : i32
      %107 = arith.index_cast %106 : i32 to index
      %c0_71 = arith.constant 0 : index
      %c0_72 = arith.constant 0 : index
      %108 = vector.load %arg11[%107, %c0_71, %c0_72] : memref<6x8x1xi32, #tpu.memory_space<vmem>>, vector<1x8x1xi32>
      %109 = vector.shape_cast %108 : vector<1x8x1xi32> to vector<8x1xi32>
      %110 = vector.broadcast %109 : vector<8x1xi32> to vector<8x128xi32>
      %111 = arith.cmpi eq, %0, %110 : vector<8x128xi32>
      %112 = arith.extui %111 : vector<8x128xi1> to vector<8x128xi32>
      %113 = arith.sitofp %112 : vector<8x128xi32> to vector<8x128xf32>
      %c0_73 = arith.constant 0 : index
      %c0_74 = arith.constant 0 : index
      %114 = vector.load %arg13[%c0_73, %c0_74] : memref<8x160xf32, #tpu.memory_space<vmem>>, vector<8x128xf32>
      tpu.vector_store %arg13[%c0_73, %c0_74], %113 {strides = array<i32>} : memref<8x160xf32, #tpu.memory_space<vmem>>, vector<8x128xf32>,
    }
    %c5_i32_12 = arith.constant 5 : i32
    return
  }
  func.func @transform_0(%arg0: i32) -> (i32, i32, i32) {
    %c0_i32 = arith.constant 0 : i32
    %c0_i32_0 = arith.constant 0 : i32
    %c0_i32_1 = arith.constant 0 : i32
    return %arg0, %c0_i32, %c0_i32_0 : i32, i32, i32
  }
  func.func @transform_1(%arg0: i32) -> (i32, i32, i32) {
    %c0_i32 = arith.constant 0 : i32
    %c0_i32_0 = arith.constant 0 : i32
    %c0_i32_1 = arith.constant 0 : i32
    return %arg0, %c0_i32, %c0_i32_0 : i32, i32, i32
  }
  func.func @transform_2(%arg0: i32) -> (i32, i32, i32) {
    %c0_i32 = arith.constant 0 : i32
    %c0_i32_0 = arith.constant 0 : i32
    %c0_i32_1 = arith.constant 0 : i32
    return %arg0, %c0_i32, %c0_i32_0 : i32, i32, i32
  }
  func.func @transform_3(%arg0: i32) -> (i32, i32, i32) {
    %c0_i32 = arith.constant 0 : i32
    %c0_i32_0 = arith.constant 0 : i32
    %c0_i32_1 = arith.constant 0 : i32
    return %arg0, %c0_i32, %c0_i32_0 : i32, i32, i32
  }
  func.func @transform_4(%arg0: i32) -> (i32, i32, i32) {
    %c0_i32 = arith.constant 0 : i32
    %c0_i32_0 = arith.constant 0 : i32
    %c0_i32_1 = arith.constant 0 : i32
    return %arg0, %c0_i32, %c0_i32_0 : i32, i32, i32
  }
  func.func @transform_5(%arg0: i32) -> (i32, i32) {
    %c0_i32 = arith.constant 0 : i32
    %c0_i32_0 = arith.constant 0 : i32
    %c0_i32_1 = arith.constant 0 : i32
    return %c0_i32, %c0_i32_0 : i32, i32
  }
  func.func @transform_6(%arg0: i32) -> (i32, i32) {
    %c0_i32 = arith.constant 0 : i32
    %c0_i32_0 = arith.constant 0 : i32
    %c0_i32_1 = arith.constant 0 : i32
    return %c0_i32, %c0_i32_0 : i32, i32
  }
  func.func @transform_7(%arg0: i32) -> (i32, i32) {
    %c0_i32 = arith.constant 0 : i32
    %c0_i32_0 = arith.constant 0 : i32
    %c0_i32_1 = arith.constant 0 : i32
    return %c0_i32, %c0_i32_0 : i32, i32
  }
  func.func @transform_8(%arg0: i32) -> (i32, i32) {
    %c0_i32 = arith.constant 0 : i32
    %c0_i32_0 = arith.constant 0 : i32
    %c0_i32_1 = arith.constant 0 : i32
    return %c0_i32, %c0_i32_0 : i32, i32
  }
  func.func @transform_9(%arg0: i32) -> (i32, i32) {
    %c0_i32 = arith.constant 0 : i32
    %c0_i32_0 = arith.constant 0 : i32
    return %arg0, %c0_i32 : i32, i32
  }
  func.func @transform_10(%arg0: i32) -> (i32, i32, i32) {
    %c0_i32 = arith.constant 0 : i32
    %c0_i32_0 = arith.constant 0 : i32
    %c0_i32_1 = arith.constant 0 : i32
    return %c0_i32, %arg0, %c0_i32_0 : i32, i32, i32
  }
  func.func @transform_11(%arg0: i32) -> (i32, i32, i32) {
    %c0_i32 = arith.constant 0 : i32
    %c0_i32_0 = arith.constant 0 : i32
    %c0_i32_1 = arith.constant 0 : i32
    return %c0_i32, %arg0, %c0_i32_0 : i32, i32, i32
  }
}

</mosaic_0001>

<bundles_post_ra>
// kernel: tpu_custom_call.1
= control target key start
LH: loop header
LB: loop body
LE: loop exit
PB: predicated region body
PF: predicated region fallthrough
CT: control target
= control target key end

     0   :  { %16 = vsyncpa [#allocation7], 0  ;;  %s1729_s0 = inlined_call_operand.hbm [shape: f32[8,8,32], index: 0, kind: input, shape index: {}]   ;;  %s1730_s1 = inlined_call_operand.vmem [shape: f32[8,1,8], index: 1, kind: input, shape index: {}]   ;;  %s1731_s2 = inlined_call_operand.vmem [shape: f32[8,1,8], index: 2, kind: input, shape index: {}]   ;;  %s1732_s3 = inlined_call_operand.vmem [shape: f32[8,1,1], index: 3, kind: input, shape index: {}]   ;;  %s1733_s4 = inlined_call_operand.hbm [shape: f32[8,8,128], index: 4, kind: input, shape index: {}]   ;;  %s1734_s5 = inlined_call_operand.hbm [shape: f32[160,128], index: 5, kind: input, shape index: {}]   ;;  %s1735_s6 = inlined_call_operand.vmem [shape: f32[1,128], index: 6, kind: input, shape index: {}]   ;;  %s1736_s7 = inlined_call_operand.hbm [shape: f32[64,128], index: 7, kind: input, shape index: {}]   ;;  %s1737_s8 = inlined_call_operand.vmem [shape: f32[1,128], index: 8, kind: input, shape index: {}]   ;;  %s1738_s9 = inlined_call_operand.vmem [shape: f32[8,32], index: 9, kind: input, shape index: {}]   ;;  %s1739_s10 = inlined_call_operand.vmem [shape: s32[6,8,1], index: 10, kind: input, shape index: {}]   ;;  %s1740_s11 = inlined_call_operand.hbm [shape: f32[5,8,128], index: 11, kind: output, shape index: {}]  }
   0x1   :  { %17 = vsyncpa [#allocation10], 0 }
   0x2   :  { %18 = vsyncpa [#allocation13], 0 }
   0x3   :  { %19 = vsyncpa [#allocation8], 0  ;;  %s43_s19 = sshll.u32 %s1733_s4, 4  ;;  %s1363_s20 = smov [#allocation9]   ;;  %s44_s19 = int_to_ptr.hbm [resolvable:$true] %s43_s19 }
   0x4   :  { %s45_s21 = sshll.u32 %s1363_s20, 4  ;;  %s24_s24 = sshll.u32 %s1729_s0, 4  ;;  %s46_s21 = int_to_ptr.vmem [resolvable:$true] %s45_s21  ;;  %s25_s24 = int_to_ptr.hbm [resolvable:$true] %s24_s24 }
   0x5   :  { %s1364_s25 = smov 128   ;;  %s1365_s26 = smov 8  }
   0x6   :  { %51 = dma.hbm_to_vmem [thread:$0]  %s44_s19, 1024, %s46_s21, [#allocation10], %s1364_s25, %s1364_s25, %s1365_s26  }
   0x7   :  { %s1366_s27 = smov [#allocation6]   ;;  %s56_s4 = sshll.u32 %s1734_s5, 4  ;;  %s57_s4 = int_to_ptr.hbm [resolvable:$true] %s56_s4 }
   0x8   :  { %s26_s28 = sshll.u32 %s1366_s27, 4  ;;  %s71_s13 = sshll.u32 %s1736_s7, 4  ;;  %s27_s28 = int_to_ptr.vmem [resolvable:$true] %s26_s28  ;;  %s72_s13 = int_to_ptr.hbm [resolvable:$true] %s71_s13 }
   0x9   :  { %32 = dma.hbm_to_vmem [thread:$0]  %s25_s24, 1024, %s27_s28, [#allocation7], %s1364_s25, %s1364_s25, %s1365_s26  }
   0xa   :  { %s1367_s14 = smov [#allocation11]   ;;  %s1368_s16 = smov [#allocation12]  }
   0xb   :  { %s58_s15 = sshll.u32 %s1367_s14, 4  ;;  %s73_s5 = sshll.u32 %s1368_s16, 4  ;;  %s59_s15 = int_to_ptr.vmem [resolvable:$true] %s58_s15  ;;  %s74_s5 = int_to_ptr.vmem [resolvable:$true] %s73_s5 }
   0xc   :  { %64 = dma.hbm_to_vmem [thread:$0]  %s57_s4, 2560, %s59_s15, [#allocation10], %s1364_s25, %s1364_s25, %s1365_s26  }
   0xd   :  { %79 = dma.hbm_to_vmem [thread:$0]  %s72_s13, 1024, %s74_s5, [#allocation13], %s1364_s25, %s1364_s25, %s1365_s26  }
   0xe   :  { %1351 = dma.done.wait [#allocation7], 1024  }
   0xf   :  { %1352 = vsyncadd [#allocation7], 4294966272 }
  0x10   :  { %1353 = dma.done.wait [#allocation10], 3584  }
  0x11   :  { %1354 = vsyncadd [#allocation10], 4294963712 }
  0x12   :  { %1355 = dma.done.wait [#allocation13], 1024  }
  0x13   :  { %1356 = vsyncadd [#allocation13], 4294966272  ;;  %v102_v0 = vlaneseq  ;;  %v1369_v2 = vmov 0.0   ;;  %vm109_vm1 = vcmask 261120   ;;  %v104_v4 = vld [vmem:[%s1738_s9] sm:$0xff]  ;;  %s1370_s18 = smov 32  }
  0x14   :  { %113 = vrot.lane.b32.xlu0 %v104_v4, %s1370_s18  ;;  %110 = vst.msk [vmem:[#allocation2 + $0x8] sm:$0xff] %vm109_vm1, %v104_v4  ;;  %vm116_vm2 = vcmask 523520   ;;  %s1472_s19 = smov 0  }
  0x15   :  { %v1461_v1 = vand.u32 127, %v102_v0  ;;  %111 = vst.msk [vmem:[#allocation3] sm:$0xff] %vm109_vm1, %v104_v4 }
  0x16   :  { %118 = vst.msk [vmem:[#allocation4] sm:$0xff] %vm109_vm1, %v104_v4 }
  0x17   :  { %vm105_vm0 = vcmp.eq.s32.totalorder %v1461_v1, 0  ;;  %119 = vst.msk [vmem:[#allocation5] sm:$0xff] %vm109_vm1, %v104_v4 }
  0x18   :  { %v1119_v3 = vsel %vm105_vm0, 1.0, %v1369_v2 }
  0x19   :  { %108 = vst [vmem:[#allocation2] sm:$0xff] %v1119_v3 }
  0x86   :  { %v114_v5 = vpop.permute.xlu0 %113 }
  0x87   :  { %117 = vst.msk [vmem:[#allocation3] sm:$0xff] %vm116_vm2, %v114_v5 }
  0x88 LB: > { %v143_v6 = vld [vmem:[#allocation11 + $0x78] sm:$0xff]  ;;  %v142_v7 = vld [vmem:[#allocation11 + $0x70] sm:$0xff]  ;;  %v141_v8 = vld [vmem:[#allocation11 + $0x68] sm:$0xff]  ;;  %s1371_s21 = smov 64   ;;  %s1372_s22 = smov 32   ;;  %vm261_vm7 = vcmask 523264   ;;  %s1361_s19 = sphi %s1472_s19, %s125_s19  }
  0x89   : > { %155 = vmatpush.msra.mxu0 %v143_v6  ;;  %v140_v9 = vld [vmem:[#allocation11 + $0x60] sm:$0xff]  ;;  %v147_v10 = vld [vmem:[#allocation11 + $0x98] sm:$0xff]  ;;  %v146_v11 = vld [vmem:[#allocation11 + $0x90] sm:$0xff]  ;;  %vm584_vm12 = vcmask 57344   ;;  %s1374_s12 = smov 96   ;;  %vm801_vm14 = vcmask 64512  }
  0x8a   : > { %187 = vmatpush.msra.mxu1 %v147_v10  ;;  %v139_v12 = vld [vmem:[#allocation11 + $0x58] sm:$0xff]  ;;  %v145_v13 = vld [vmem:[#allocation11 + $0x88] sm:$0xff]  ;;  %v138_v14 = vld [vmem:[#allocation11 + $0x50] sm:$0xff]  ;;  %s1148_s0 = sshll.u32 %s1361_s19, 3  ;;  %s125_s19 = sadd.s32 1, %s1361_s19  }
  0x8b   : > { %156 = vmatpush.msra.mxu0 %v142_v7  ;;  %v144_v15 = vld [vmem:[#allocation11 + $0x80] sm:$0xff]  ;;  %v137_v17 = vld [vmem:[#allocation11 + $0x48] sm:$0xff]  ;;  %v135_v19 = vld [vmem:[#allocation11 + $0x38] sm:$0xff]  ;;  %s1112_s14 = scalar_lea.vmem %s1739_s10, %s1148_s0  ;;  %p122_p0 = scmp.ge.s32.totalorder %s125_s19, 5  }
  0x8c   : > { %188 = vmatpush.msra.mxu1 %v146_v11  ;;  %v127_v16 = vld [vmem:[#allocation2 + $0x8] sm:$0xff]  ;;  %v134_v20 = vld [vmem:[#allocation11 + $0x30] sm:$0xff]  ;;  %v133_v21 = vld [vmem:[#allocation11 + $0x28] sm:$0xff]  ;;  %s1094_s9 = sshll.u32 (%p122_p0), %s1740_s11, 4  ;;  %s1376_s20 = smov (%p122_p0), [#allocation14]   ;;  %s1095_s9 = int_to_ptr.hbm [resolvable:$true] %s1094_s9 }
  0x8d   : > { %157 = vmatpush.msra.mxu0 %v141_v8  ;;  %v136_v18 = vld [vmem:[#allocation11 + $0x40] sm:$0xff]  ;;  %v131_v23 = vld [vmem:[#allocation11 + $0x18] sm:$0xff]  ;;  %v130_v24 = vld [vmem:[#allocation11 + $0x10] sm:$0xff] }
  0x8e   : > { %189 = vmatpush.msra.mxu1 %v145_v13  ;;  %v132_v22 = vld [vmem:[#allocation11 + $0x20] sm:$0xff]  ;;  %v129_v25 = vld [vmem:[#allocation11 + $0x8] sm:$0xff]  ;;  %v126_v27 = vld [vmem:[#allocation2] sm:$0xff] }
  0x8f   : > { %158 = vmatpush.msra.mxu0 %v140_v9  ;;  %v128_v26 = vld [vmem:[#allocation11] sm:$0xff]  ;;  %v1177_v28 = vld [vmem:[%s1735_s6] ss:$0 sm:$0xff]  ;;  %v215_v34 = vld [vmem:[#allocation4] sm:$0xff] }
  0x90   : > { %190 = vmatpush.msra.mxu1 %v144_v15  ;;  %v256_v55 = vld [vmem:[#allocation12 + $0x38] sm:$0xff]  ;;  %v255_v56 = vld [vmem:[#allocation12 + $0x30] sm:$0xff]  ;;  %v254_v57 = vld [vmem:[#allocation12 + $0x28] sm:$0xff] }
  0x91   : > { %159 = vmatpush.msra.mxu0 %v139_v12  ;;  %1120 = vmatmul.msk.f32.vlgmr.msra.gmra.mxu1 %vm109_vm1, %v127_v16  ;;  %v253_v58 = vld [vmem:[#allocation12 + $0x20] sm:$0xff]  ;;  %v252_v61 = vld [vmem:[#allocation12 + $0x18] sm:$0xff]  ;;  %v251_v62 = vld [vmem:[#allocation12 + $0x10] sm:$0xff] }
  0x92   : > { %273 = vmatpush.msra.mxu2 %v256_v55  ;;  %v250_v63 = vld [vmem:[#allocation12 + $0x8] sm:$0xff]  ;;  %v249_v0 = vld [vmem:[#allocation12] sm:$0xff]  ;;  %v305_v2 = vld [vmem:[#allocation5] sm:$0xff] }
  0x93   : > { %160 = vmatpush.msra.mxu0 %v138_v14  ;;  %v1178_v5 = vld [vmem:[%s1737_s8] ss:$0 sm:$0xff] }
  0x94   : > { %274 = vmatpush.msra.mxu2 %v255_v56  ;;  %v347_v55 = vld [vmem:[#allocation6 + $0x18] sm:$0xff] }
  0x95   : > { %161 = vmatpush.msra.mxu0 %v137_v17 }
  0x96   : > { %275 = vmatpush.msra.mxu2 %v254_v57 }
  0x97   : > { %162 = vmatpush.msra.mxu0 %v136_v18 }
  0x98   : > { %276 = vmatpush.msra.mxu2 %v253_v58  ;;  %v350_v58 = vld [vmem:[#allocation6 + $0x30] sm:$0xff] }
  0x99   : > { %163 = vmatpush.msra.mxu0 %v135_v19 }
  0x9a   : > { %277 = vmatpush.msra.mxu2 %v252_v61 }
  0x9b   : > { %164 = vmatpush.msra.mxu0 %v134_v20 }
  0x9c   : > { %278 = vmatpush.msra.mxu2 %v251_v62 }
  0x9d   : > { %165 = vmatpush.msra.mxu0 %v133_v21 }
  0x9e   : > { %279 = vmatpush.msra.mxu2 %v250_v63  ;;  %v354_v63 = vld [vmem:[%s1730_s1 + $0x2] sm:$0x1] }
  0x9f   : > { %166 = vmatpush.msra.mxu0 %v132_v22 }
  0xa0   : > { %280 = vmatpush.msra.mxu2 %v249_v0 }
  0xa1   : > { %167 = vmatpush.msra.mxu0 %v131_v23 }
  0xa3   : > { %168 = vmatpush.msra.mxu0 %v130_v24 }
  0xa5   : > { %169 = vmatpush.msra.mxu0 %v129_v25 }
  0xa7   : > { %170 = vmatpush.msra.mxu0 %v128_v26 }
  0xa8   : > { %171 = vmatmul.f32.vlgmr.msra.gmra.mxu0 %v126_v27 }
 0x10e   : > { %v192_v30 = vpop.f32.mrf.mxu1 }
 0x125   : > { %v172_v29 = vpop.f32.mrf.mxu0 }
 0x126   : > { %v173_v31 = vadd.f32 %v1177_v28, %v172_v29  ;;  %v346_v29 = vld [vmem:[#allocation6 + $0x10] sm:$0xff] }
 0x127   : > { %1128 = vmatpush.xpose.msk.msrb.mxu1 %vm109_vm1, %v346_v29 }
 0x128   : > { %v193_v32 = vadd.f32 %v192_v30, %v173_v31 }
 0x12a   : > { %1179 = vtanh.f32 %v193_v32  ;;  %v1121_v35 = vmul.f32 -1.442695, %v193_v32 }
 0x12c   : > { %1181 = vpow2.f32 %v1121_v35 }
 0x130   : > { %v1180_v33 = vpop.eup %1179 }
 0x131   : > { %222 = vrot.lane.b32.xlu0 %v1180_v33, %s1371_s21 }
 0x132   : > { %v1182_v36 = vpop.eup %1181 }
 0x133   : > { %v198_v37 = vadd.f32 1.0, %v1182_v36 }
 0x135   : > { %1183 = vrcp.f32 %v198_v37  ;;  %v210_v43 = vand.u32 2147483648, %v198_v37  ;;  %vm204_vm4 = vweird.f32 %v198_v37  ;;  %v208_v44 = vand.u32 2147483647, %v198_v37 }
 0x137   : > { %v211_v46 = vor.u32 1.1754944e-38, %v210_v43  ;;  %vm209_vm6 = vcmp.eq.f32.partialorder %v208_v44, 8.507059e+37 }
 0x139   : > { %217 = vrot.lane.b32.xlu0 %v215_v34, %s1372_s22 }
 0x13b   : > { %v1184_v38 = vpop.eup %1183 }
 0x13c   : > { %v200_v39 = vmul.f32 %v1184_v38, %v198_v37  ;;  %vm205_vm3 = vweird.f32 %v1184_v38 }
 0x13d   : > { %vm206_vm5 = vmor %vm204_vm4, %vm205_vm3 }
 0x13e   : > { %v201_v40 = vsub.f32 1.0, %v200_v39 }
 0x140   : > { %v202_v41 = vmul.f32 %v1184_v38, %v201_v40 }
 0x141   : > { %307 = vrot.lane.b32.xlu0 %v305_v2, %s1372_s22 }
 0x142   : > { %v203_v42 = vadd.f32 %v1184_v38, %v202_v41 }
 0x144   : > { %v207_v45 = vsel %vm206_vm5, %v1184_v38, %v203_v42 }
 0x145   : > { %v212_v48 = vsel %vm209_vm6, %v211_v46, %v207_v45 }
 0x1a3   : > { %v223_v47 = vpop.permute.xlu0 %222 }
 0x1a4   : > { %v225_v49 = vmul.f32 %v223_v47, %v212_v48  ;;  %v348_v47 = vld [vmem:[#allocation6 + $0x20] sm:$0xff] }
 0x1a5   : > { %1132 = vmatpush.xpose.msk.msra.mxu1 %vm109_vm1, %v348_v47 }
 0x1a6   : > { %227 = vrot.lane.b32.xlu1 %v225_v49, %s1372_s22  ;;  %v345_v49 = vld [vmem:[#allocation6 + $0x8] sm:$0xff] }
 0x1ab   : > { %v218_v50 = vpop.permute.xlu0 %217 }
 0x1ac   : > { %v220_v51 = vmul.f32 %v218_v50, %v212_v48  ;;  %v349_v50 = vld [vmem:[#allocation6 + $0x28] sm:$0xff] }
 0x1ad   : > { %1134 = vmatpush.xpose.msk.msrb.mxu2 %vm109_vm1, %v349_v50 }
 0x1b3   : > { %v308_v24 = vpop.permute.xlu0 %307 }
 0x218   : > { %v228_v52 = vpop.permute.xlu1 %227 }
 0x219   : > { %v1484_v53 = vadd.f32 %v228_v52, %v220_v51  ;;  %v351_v52 = vld [vmem:[#allocation6 + $0x38] sm:$0xff] }
 0x21b   : > { %1185 = vtanh.f32 %v1484_v53 }
 0x221   : > { %v1186_v54 = vpop.eup %1185 }
 0x222   : > { %233 = vrot.lane.b32.xlu1 %v1186_v54, %s1371_s21 }
 0x294   : > { %v234_v59 = vpop.permute.xlu1 %233 }
 0x295   : > { %v236_v60 = vmul.f32 %v234_v59, %v212_v48  ;;  %v344_v48 = vld [vmem:[#allocation6] sm:$0xff] }
 0x296   : > { %1124 = vmatpush.xpose.msk.msra.mxu3 %vm109_vm1, %v344_v48 }
 0x297   : > { %243 = vrot.lane.b32.xlu2 %v236_v60, %s1372_s22 }
 0x29a   : > { %1126 = vmatpush.xpose.msk.msrb.mxu3 %vm109_vm1, %v345_v49 }
 0x2f1   : > { %v244_v3 = vpop.permute.xlu2 %243 }
 0x2f2   : > { %246 = vst.msk [vmem:[#allocation2 + $0x8] sm:$0xff] %vm109_vm1, %v244_v3 }
 0x2f3   : > { %247 = vst.msk [vmem:[#allocation3] sm:$0xff] %vm109_vm1, %v244_v3 }
 0x2fa   : > { %v248_v4 = vld [vmem:[#allocation3] sm:$0xff] }
 0x2fb   : > { %1122 = vmatmul.msk.f32.vlgmr.msra.gmra.mxu2 %vm261_vm7, %v248_v4  ;;  %v352_v4 = vld [vmem:[%s1730_s1] sm:$0x1] }
 0x37e   : > { %v282_v6 = vpop.f32.mrf.mxu2 }
 0x37f   : > { %v283_v7 = vadd.f32 %v1178_v5, %v282_v6 }
 0x381   : > { %1187 = vtanh.f32 %v283_v7  ;;  %v1123_v9 = vmul.f32 -1.442695, %v283_v7 }
 0x383   : > { %1189 = vpow2.f32 %v1123_v9 }
 0x387   : > { %v1188_v8 = vpop.eup %1187 }
 0x388   : > { %312 = vrot.lane.b32.xlu2 %v1188_v8, %s1371_s21  ;;  %v356_v8 = vld [vmem:[%s1730_s1 + $0x4] sm:$0x1] }
 0x389   : > { %v1190_v10 = vpop.eup %1189 }
 0x38a   : > { %v288_v11 = vadd.f32 1.0, %v1190_v10  ;;  %v353_v10 = vld [vmem:[%s1730_s1 + $0x1] sm:$0x1] }
 0x38c   : > { %1191 = vrcp.f32 %v288_v11  ;;  %v300_v17 = vand.u32 2147483648, %v288_v11  ;;  %vm294_vm9 = vweird.f32 %v288_v11  ;;  %v298_v18 = vand.u32 2147483647, %v288_v11 }
 0x38e   : > { %v301_v20 = vor.u32 1.1754944e-38, %v300_v17  ;;  %vm299_vm11 = vcmp.eq.f32.partialorder %v298_v18, 8.507059e+37  ;;  %v355_v18 = vld [vmem:[%s1730_s1 + $0x3] sm:$0x1] }
 0x392   : > { %v1192_v12 = vpop.eup %1191 }
 0x393   : > { %v290_v13 = vmul.f32 %v1192_v12, %v288_v11  ;;  %vm295_vm8 = vweird.f32 %v1192_v12 }
 0x394   : > { %vm296_vm10 = vmor %vm294_vm9, %vm295_vm8  ;;  %vm1035_vm9 = vcmask 1041409  }
 0x395   : > { %v291_v14 = vsub.f32 1.0, %v290_v13 }
 0x397   : > { %v292_v15 = vmul.f32 %v1192_v12, %v291_v14 }
 0x399   : > { %v293_v16 = vadd.f32 %v1192_v12, %v292_v15 }
 0x39b   : > { %v297_v19 = vsel %vm296_vm10, %v1192_v12, %v293_v16  ;;  %v357_v16 = vld [vmem:[%s1730_s1 + $0x5] sm:$0x1]  ;;  %vm1037_vm10 = vcmask 1042434  }
 0x39c   : > { %v302_v21 = vsel %vm299_vm11, %v301_v20, %v297_v19  ;;  %vm1039_vm11 = vcmask 1043459  }
 0x39d   : > { %v310_v25 = vmul.f32 %v308_v24, %v302_v21  ;;  %v359_v24 = vld [vmem:[%s1730_s1 + $0x7] sm:$0x1] }
 0x3e2   : > { %v313_v22 = vpop.permute.xlu2 %312 }
 0x3e3   : > { %v315_v23 = vmul.f32 %v313_v22, %v302_v21 }
 0x3e5   : > { %317 = vrot.lane.b32.xlu1 %v315_v23, %s1372_s22 }
 0x457   : > { %v318_v26 = vpop.permute.xlu1 %317 }
 0x458   : > { %v1497_v27 = vadd.f32 %v318_v26, %v310_v25  ;;  %v358_v26 = vld [vmem:[%s1730_s1 + $0x6] sm:$0x1] }
 0x45a   : > { %1193 = vtanh.f32 %v1497_v27 }
 0x460   : > { %v1194_v28 = vpop.eup %1193 }
 0x461   : > { %323 = vrot.lane.b32.xlu2 %v1194_v28, %s1371_s21 }
 0x4bb   : > { %v324_v30 = vpop.permute.xlu2 %323 }
 0x4bc   : > { %v1502_v31 = vmul.f32 %v324_v30, %v302_v21 }
 0x4be   : > { %v360_v32 = vperm.slane %v1502_v31, 0  ;;  %v338_v33 = vrot.slane %v1502_v31, 2  ;;  %v337_v34 = vrot.slane %v1502_v31, 1  ;;  %v339_v37 = vrot.slane %v1502_v31, 3 }
 0x4bf   : > { %v340_v38 = vrot.slane %v1502_v31, 4  ;;  %v341_v39 = vrot.slane %v1502_v31, 5  ;;  %v342_v43 = vrot.slane %v1502_v31, 6  ;;  %v343_v44 = vrot.slane %v1502_v31, 7 }
 0x4c0   : > { %361 = vrot.lane.b32.xlu0 %v360_v32, %s1372_s22  ;;  %v416_v35 = vperm.slane %v338_v33, 0  ;;  %v388_v36 = vperm.slane %v337_v34, 0  ;;  %v444_v40 = vperm.slane %v339_v37, 0 }
 0x4c1   : > { %v472_v41 = vperm.slane %v340_v38, 0  ;;  %v500_v42 = vperm.slane %v341_v39, 0  ;;  %v528_v45 = vperm.slane %v342_v43, 0  ;;  %v556_v46 = vperm.slane %v343_v44, 0 }
 0x4c2   : > { %417 = vrot.lane.b32.xlu2 %v416_v35, %s1372_s22  ;;  %389 = vrot.lane.b32.xlu1 %v388_v36, %s1372_s22 }
 0x4c8   : > { %445 = vrot.lane.b32.xlu0 %v444_v40, %s1372_s22 }
 0x4ca   : > { %473 = vrot.lane.b32.xlu2 %v472_v41, %s1372_s22  ;;  %501 = vrot.lane.b32.xlu1 %v500_v42, %s1372_s22 }
 0x4d0   : > { %529 = vrot.lane.b32.xlu0 %v528_v45, %s1372_s22 }
 0x4d2   : > { %557 = vrot.lane.b32.xlu1 %v556_v46, %s1372_s22  ;;  %s1092_s22 = sshll.u32 (%p122_p0), %s1376_s20, 4  ;;  %s1093_s22 = int_to_ptr.vmem [resolvable:$true] %s1092_s22 }
 0x51c   : > { %v418_v51 = vpop.permute.xlu2 %417 }
 0x51d   : > { %1129 = vmatmul.msk.f32.vlgmr.msrb.gmra.mxu1 %vm109_vm1, %v418_v51 }
 0x51e   : > { %1138 = vmatpush.xpose.msk.msrb.mxu1 %vm109_vm1, %v351_v52 }
 0x524   : > { %v474_v54 = vpop.permute.xlu2 %473 }
 0x525   : > { %1133 = vmatmul.msk.f32.vlgmr.msra.gmra.mxu1 %vm109_vm1, %v474_v54 }
 0x532   : > { %v362_v56 = vpop.permute.xlu0 %361 }
 0x533   : > { %1125 = vmatmul.msk.f32.vlgmr.msra.gmra.mxu3 %vm109_vm1, %v362_v56 }
 0x534   : > { %v390_v57 = vpop.permute.xlu1 %389  ;;  %1130 = vmatpush.xpose.msk.msra.mxu3 %vm109_vm1, %v347_v55 }
 0x53a   : > { %v446_v60 = vpop.permute.xlu0 %445 }
 0x53b   : > { %1127 = vmatmul.msk.f32.vlgmr.msrb.gmra.mxu3 %vm109_vm1, %v390_v57 }
 0x53c   : > { %v502_v59 = vpop.permute.xlu1 %501  ;;  %1136 = vmatpush.xpose.msk.msrb.mxu3 %vm109_vm1, %v350_v58 }
 0x53d   : > { %1135 = vmatmul.msk.f32.vlgmr.msrb.gmra.mxu2 %vm109_vm1, %v502_v59 }
 0x542   : > { %v530_v62 = vpop.permute.xlu0 %529 }
 0x543   : > { %1131 = vmatmul.msk.f32.vlgmr.msra.gmra.mxu3 %vm109_vm1, %v446_v60 }
 0x544   : > { %v558_v61 = vpop.permute.xlu1 %557 }
 0x545   : > { %1139 = vmatmul.msk.f32.vlgmr.msrb.gmra.mxu1 %vm109_vm1, %v558_v61 }
 0x54b   : > { %1137 = vmatmul.msk.f32.vlgmr.msrb.gmra.mxu3 %vm109_vm1, %v530_v62 }
 0x59a   : > { %v441_v0 = vpop.f32.mrf.mxu1 }
 0x59b   : > { %v442_v2 = vadd.f32 %v441_v0, %v354_v63 }
 0x59d   : > { %v591_v3 = vsel %vm584_vm12, %v442_v2, -inf }
 0x59e   : > { %592 = vmax.xlane.f32.xlu1 %v591_v3 }
 0x5a2   : > { %v497_v9 = vpop.f32.mrf.mxu1 }
 0x5a3   : > { %v498_v11 = vadd.f32 %v497_v9, %v356_v8 }
 0x5a5   : > { %v597_v14 = vsel %vm584_vm12, %v498_v11, -inf }
 0x5b6   : > { %v385_v5 = vpop.f32.mrf.mxu3 }
 0x5b7   : > { %v386_v6 = vadd.f32 %v385_v5, %v352_v4 }
 0x5b9   : > { %v585_v7 = vsel %vm584_vm12, %v386_v6, -inf }
 0x5ba   : > { %586 = vmax.xlane.f32.xlu2 %v585_v7 }
 0x5be   : > { %v413_v12 = vpop.f32.mrf.mxu3 }
 0x5bf   : > { %v414_v13 = vadd.f32 %v413_v12, %v353_v10  ;;  %v1373_v12 = vmov 0  }
 0x5c0   : > { %v525_v17 = vpop.f32.mrf.mxu2  ;;  %1176 = vset.pattern.permute.xlu1 %v1373_v12  ;;  %1174 = vset.pattern.permute.xlu2 %v1373_v12 }
 0x5c1   : > { %v588_v15 = vsel %vm584_vm12, %v414_v13, -inf  ;;  %v526_v19 = vadd.f32 %v525_v17, %v357_v16  ;;  %1175 = vset.pattern.permute.xlu0 %v1373_v12  ;;  %v657_v16 = vld [vmem:[%s1732_s3] sm:$0x1] }
 0x5c2   : > { %598 = vmax.xlane.f32.xlu2 %v597_v14  ;;  %589 = vmax.xlane.f32.xlu0 %v588_v15  ;;  %v581_v25 = vpop.f32.mrf.mxu1 }
 0x5c3   : > { %v600_v23 = vsel %vm584_vm12, %v526_v19, -inf  ;;  %v582_v28 = vadd.f32 %v581_v25, %v359_v24  ;;  %v662_v25 = vld [vmem:[%s1732_s3 + $0x5] sm:$0x1] }
 0x5c5   : > { %v606_v33 = vsel %vm584_vm12, %v582_v28, -inf }
 0x5c6   : > { %v469_v20 = vpop.f32.mrf.mxu3 }
 0x5c7   : > { %v470_v21 = vadd.f32 %v469_v20, %v355_v18  ;;  %v658_v20 = vld [vmem:[%s1732_s3 + $0x1] sm:$0x1] }
 0x5c9   : > { %v594_v22 = vsel %vm584_vm12, %v470_v21, -inf }
 0x5ca   : > { %595 = vmax.xlane.f32.xlu2 %v594_v22  ;;  %601 = vmax.xlane.f32.xlu0 %v600_v23 }
 0x5ce   : > { %v553_v29 = vpop.f32.mrf.mxu3 }
 0x5cf   : > { %v554_v30 = vadd.f32 %v553_v29, %v358_v26  ;;  %v664_v29 = vld [vmem:[%s1732_s3 + $0x7] sm:$0x1] }
 0x5d1   : > { %v603_v32 = vsel %vm584_vm12, %v554_v30, -inf }
 0x5d2   : > { %604 = vmax.xlane.f32.xlu1 %v603_v32  ;;  %607 = vmax.xlane.f32.xlu2 %v606_v33  ;;  %v660_v33 = vld [vmem:[%s1732_s3 + $0x3] sm:$0x1] }
 0x611   : > { %v593_v34 = vpop.xlane.xlu1 %592 }
 0x612   : > { %v611_v35 = vsub.f32 %v442_v2, %v593_v34 }
 0x614   : > { %v621_v36 = vmul.f32 1.442695, %v611_v35 }
 0x616   : > { %1195 = vpow2.f32 %v621_v36 }
 0x61c   : > { %v1567_v37 = vpop.eup %1195 }
 0x61d   : > { %v639_v38 = vsel %vm584_vm12, %v1567_v37, 0.0 }
 0x61e   : > { %640 = vadd.xlane.f32.xlu2 %v639_v38 }
 0x62d   : > { %v587_v39 = vpop.xlane.xlu2 %586 }
 0x62e   : > { %v609_v40 = vsub.f32 %v386_v6, %v587_v39  ;;  %v795_v39 = vld [vmem:[#allocation9 + $0x10] sm:$0xff] }
 0x62f   : > { %866 = vmatpush.msrb.mxu0 %v795_v39 }
 0x630   : > { %v617_v41 = vmul.f32 1.442695, %v609_v40  ;;  %v793_v40 = vld [vmem:[#allocation9] sm:$0xff] }
 0x631   : > { %820 = vmatpush.msra.mxu2 %v793_v40 }
 0x632   : > { %1197 = vpow2.f32 %v617_v41  ;;  %v797_v41 = vld [vmem:[#allocation9 + $0x20] sm:$0xff] }
 0x633   : > { %912 = vmatpush.msrb.mxu2 %v797_v41 }
 0x635   : > { %v599_v42 = vpop.xlane.xlu2 %598  ;;  %v590_v43 = vpop.xlane.xlu0 %589 }
 0x636   : > { %v613_v44 = vsub.f32 %v498_v11, %v599_v42  ;;  %v610_v45 = vsub.f32 %v414_v13, %v590_v43  ;;  %v659_v13 = vld [vmem:[%s1732_s3 + $0x2] sm:$0x1] }
 0x638   : > { %v1571_v46 = vpop.eup %1197  ;;  %v625_v47 = vmul.f32 1.442695, %v613_v44  ;;  %v619_v48 = vmul.f32 1.442695, %v610_v45 }
 0x639   : > { %v633_v49 = vsel %vm584_vm12, %v1571_v46, 0.0 }
 0x63a   : > { %1199 = vpow2.f32 %v625_v47  ;;  %634 = vadd.xlane.f32.xlu0 %v633_v49 }
 0x63b   : > { %1201 = vpow2.f32 %v619_v48 }
 0x63d   : > { %v596_v50 = vpop.xlane.xlu2 %595  ;;  %v602_v51 = vpop.xlane.xlu0 %601 }
 0x63e   : > { %v614_v52 = vsub.f32 %v526_v19, %v602_v51  ;;  %v612_v63 = vsub.f32 %v470_v21, %v596_v50  ;;  %v661_v19 = vld [vmem:[%s1732_s3 + $0x4] sm:$0x1] }
 0x640   : > { %v1575_v54 = vpop.eup %1199  ;;  %v627_v55 = vmul.f32 1.442695, %v614_v52  ;;  %v623_v5 = vmul.f32 1.442695, %v612_v63 }
 0x641   : > { %v1577_v56 = vpop.eup %1201  ;;  %v645_v57 = vsel %vm584_vm12, %v1575_v54, 0.0 }
 0x642   : > { %v636_v58 = vsel %vm584_vm12, %v1577_v56, 0.0  ;;  %646 = vadd.xlane.f32.xlu0 %v645_v57  ;;  %1203 = vpow2.f32 %v627_v55 }
 0x643   : > { %637 = vadd.xlane.f32.xlu1 %v636_v58  ;;  %v779_v58 = vld [vmem:[%s1731_s2 + $0x2] sm:$0x1] }
 0x645   : > { %v608_v59 = vpop.xlane.xlu2 %607  ;;  %v605_v60 = vpop.xlane.xlu1 %604 }
 0x646   : > { %v616_v61 = vsub.f32 %v582_v28, %v608_v59  ;;  %v615_v62 = vsub.f32 %v554_v30, %v605_v60 }
 0x648   : > { %v631_v0 = vmul.f32 1.442695, %v616_v61  ;;  %v629_v2 = vmul.f32 1.442695, %v615_v62  ;;  %v1583_v3 = vpop.eup %1203 }
 0x649   : > { %v648_v4 = vsel %vm584_vm12, %v1583_v3, 0.0 }
 0x64a   : > { %1205 = vpow2.f32 %v631_v0  ;;  %649 = vadd.xlane.f32.xlu2 %v648_v4 }
 0x64b   : > { %1207 = vpow2.f32 %v629_v2  ;;  %v777_v2 = vld [vmem:[%s1731_s2] sm:$0x1] }
 0x64c   : > { %1209 = vpow2.f32 %v623_v5 }
 0x650   : > { %v1587_v6 = vpop.eup %1205 }
 0x651   : > { %v1589_v7 = vpop.eup %1207  ;;  %v654_v8 = vsel %vm584_vm12, %v1587_v6, 0.0 }
 0x652   : > { %655 = vadd.xlane.f32.xlu1 %v654_v8  ;;  %v651_v9 = vsel %vm584_vm12, %v1589_v7, 0.0  ;;  %v1595_v10 = vpop.eup %1209 }
 0x653   : > { %652 = vadd.xlane.f32.xlu0 %v651_v9  ;;  %v642_v11 = vsel %vm584_vm12, %v1595_v10, 0.0 }
 0x65a   : > { %643 = vadd.xlane.f32.xlu1 %v642_v11  ;;  %v794_v11 = vld [vmem:[#allocation9 + $0x8] sm:$0xff] }
 0x65b   : > { %843 = vmatpush.msra.mxu3 %v794_v11 }
 0x691   : > { %v641_v14 = vpop.xlane.xlu2 %640 }
 0x692   : > { %v667_v15 = vmul.f32 %v659_v13, %v641_v14  ;;  %1211 = vrcp.f32 %v641_v14 }
 0x694   : > { %687 = vperm.xlu1 %1176, %v667_v15  }
 0x698   : > { %v1212_v42 = vpop.eup %1211 }
 0x699   : > { %v739_v43 = vmul.f32 %v1212_v42, %v641_v14 }
 0x69b   : > { %v747_v45 = vsub.f32 2.0, %v739_v43 }
 0x69d   : > { %v755_v48 = vmul.f32 %v1212_v42, %v747_v45  ;;  %v800_v45 = vld [vmem:[#allocation9 + $0x38] sm:$0xff] }
 0x69f   : > { %v763_v57 = vmul.f32 %v1567_v37, %v755_v48 }
 0x6ad   : > { %v635_v17 = vpop.xlane.xlu0 %634 }
 0x6ae   : > { %v665_v18 = vmul.f32 %v657_v16, %v635_v17  ;;  %1213 = vrcp.f32 %v635_v17  ;;  %v781_v16 = vld [vmem:[%s1731_s2 + $0x4] sm:$0x1] }
 0x6b0   : > { %675 = vperm.xlu2 %1174, %v665_v18  }
 0x6b4   : > { %v1214_v44 = vpop.eup %1213 }
 0x6b5   : > { %v647_v21 = vpop.xlane.xlu0 %646  ;;  %v737_v47 = vmul.f32 %v1214_v44, %v635_v17  ;;  %v798_v17 = vld [vmem:[#allocation9 + $0x28] sm:$0xff] }
 0x6b6   : > { %v669_v22 = vmul.f32 %v661_v19, %v647_v21  ;;  %v1611_v23 = vpop.xlane.xlu1 %637  ;;  %1215 = vrcp.f32 %v647_v21  ;;  %935 = vmatpush.msrb.mxu3 %v798_v17 }
 0x6b7   : > { %v666_v24 = vmul.f32 %v658_v20, %v1611_v23  ;;  %v745_v49 = vsub.f32 2.0, %v737_v47 }
 0x6b8   : > { %699 = vperm.xlu2 %1174, %v669_v22  }
 0x6b9   : > { %681 = vperm.xlu0 %1175, %v666_v24  }
 0x6bc   : > { %v1216_v50 = vpop.eup %1215 }
 0x6bd   : > { %v650_v26 = vpop.xlane.xlu2 %649  ;;  %v741_v55 = vmul.f32 %v1216_v50, %v647_v21 }
 0x6be   : > { %v670_v28 = vmul.f32 %v662_v25, %v650_v26  ;;  %1217 = vrcp.f32 %v650_v26 }
 0x6bf   : > { %v749_v63 = vsub.f32 2.0, %v741_v55  ;;  %1219 = vrcp.f32 %v1611_v23 }
 0x6c0   : > { %705 = vperm.xlu2 %1174, %v670_v28  }
 0x6c1   : > { %238 = vrot.lane.b32.xlu0 %v1484_v53, %s1374_s12  ;;  %v663_v53 = vld [vmem:[%s1732_s3 + $0x6] sm:$0x1]  ;;  %v757_v9 = vmul.f32 %v1216_v50, %v749_v63  ;;  %v778_v50 = vld [vmem:[%s1731_s2 + $0x1] sm:$0x1] }
 0x6c4   : > { %v1218_v5 = vpop.eup %1217 }
 0x6c5   : > { %v1621_v30 = vpop.xlane.xlu1 %655  ;;  %v742_v12 = vmul.f32 %v1218_v5, %v650_v26  ;;  %v796_v26 = vld [vmem:[#allocation9 + $0x18] sm:$0xff] }
 0x6c6   : > { %v672_v32 = vmul.f32 %v664_v29, %v1621_v30  ;;  %v1633_v36 = vpop.xlane.xlu0 %652  ;;  %1221 = vrcp.f32 %v1621_v30  ;;  %889 = vmatpush.msra.mxu1 %v796_v26  ;;  %v1220_v29 = vpop.eup %1219 }
 0x6c7   : > { %v671_v38 = vmul.f32 %v663_v53, %v1633_v36  ;;  %v750_v18 = vsub.f32 2.0, %v742_v12 }
 0x6c8   : > { %717 = vperm.xlu2 %1174, %v672_v32   ;;  %981 = vmatpush.msrb.mxu1 %v800_v45 }
 0x6c9   : > { %v758_v21 = vmul.f32 %v1218_v5, %v750_v18 }
 0x6cb   : > { %v766_v28 = vmul.f32 %v1583_v3, %v758_v21 }
 0x6cc   : > { %v1222_v53 = vpop.eup %1221 }
 0x6cd   : > { %v1627_v34 = vpop.xlane.xlu1 %643  ;;  %v744_v40 = vmul.f32 %v1222_v53, %v1621_v30 }
 0x6ce   : > { %v668_v35 = vmul.f32 %v660_v33, %v1627_v34  ;;  %1223 = vrcp.f32 %v1627_v34 }
 0x6cf   : > { %v752_v42 = vsub.f32 2.0, %v744_v40  ;;  %1225 = vrcp.f32 %v1633_v36 }
 0x6d0   : > { %693 = vperm.xlu1 %1176, %v668_v35   ;;  %v738_v35 = vmul.f32 %v1220_v29, %v1611_v23 }
 0x6d2   : > { %v746_v39 = vsub.f32 2.0, %v738_v35 }
 0x6d4   : > { %v754_v41 = vmul.f32 %v1220_v29, %v746_v39 }
 0x6d6   : > { %v762_v23 = vmul.f32 %v1577_v56, %v754_v41 }
 0x6d8   : > { %711 = vperm.xlu1 %1176, %v671_v38  }
 0x6e0   : > { %328 = vrot.lane.b32.xlu1 %v1497_v27, %s1374_s12  ;;  %v753_v27 = vmul.f32 %v1214_v44, %v745_v49  ;;  %v799_v44 = vld [vmem:[#allocation9 + $0x30] sm:$0xff]  ;;  %v760_v49 = vmul.f32 %v1222_v53, %v752_v42 }
 0x6e1   : > { %958 = vmatpush.msra.mxu0 %v799_v44 }
 0x6e2   : > { %v761_v0 = vmul.f32 %v1571_v46, %v753_v27 }
 0x706   : > { %v688_v51 = vpop.permute.xlu1 %687 }
 0x707   : > { %v690_v52 = vperm.slane %v688_v51, 0 }
 0x709   : > { %vm723_vm13 = vcmp.ge.f32.partialorder %v1567_v37, %v690_v52  ;;  %v768_v52 = vmul.f32 %v1587_v6, %v760_v49 }
 0x70a   : > { %v771_v59 = vsel %vm723_vm13, %v763_v57, 0.0  ;;  %v676_v60 = vpop.permute.xlu2 %675  ;;  %vm1043_vm13 = vcmask 1045509  }
 0x70b   : > { %v787_v61 = vmul.f32 %v779_v58, %v771_v59  ;;  %v678_v62 = vperm.slane %v676_v60, 0  ;;  %v1224_v58 = vpop.eup %1223  ;;  %v1150_v60 = vld [vmem:[%s1112_s14 + $0x8] sm:$0xff] }
 0x70c   : > { %v1226_v63 = vpop.eup %1225 }
 0x70d   : > { %vm721_vm15 = vcmp.ge.f32.partialorder %v1571_v46, %v678_v62  ;;  %1142 = vmatmul.msk.f32.vlgmr.msrb.gmra.mxu0 %vm801_vm14, %v787_v61  ;;  %v992_v4 = vsel %vm584_vm12, %v787_v61, 0.0  ;;  %v765_v46 = vmul.f32 %v1575_v54, %v757_v9 }
 0x70e   : > { %v769_v37 = vsel %vm721_vm15, %v761_v0, 0.0  ;;  %993 = vadd.xlane.f32.xlu1 %v992_v4  ;;  %v743_v0 = vmul.f32 %v1226_v63, %v1633_v36  ;;  %vm1047_vm15 = vcmask 1047559  }
 0x70f   : > { %v785_v8 = vmul.f32 %v777_v2, %v769_v37 }
 0x710   : > { %v751_v37 = vsub.f32 2.0, %v743_v0 }
 0x711   : > { %1140 = vmatmul.msk.f32.vlgmr.msra.gmra.mxu2 %vm801_vm14, %v785_v8  ;;  %v986_v13 = vsel %vm584_vm12, %v785_v8, 0.0 }
 0x712   : > { %v700_v14 = vpop.permute.xlu2 %699  ;;  %987 = vadd.xlane.f32.xlu2 %v986_v13  ;;  %v759_v12 = vmul.f32 %v1226_v63, %v751_v37 }
 0x713   : > { %v702_v15 = vperm.slane %v700_v14, 0 }
 0x715   : > { %vm725_vm0 = vcmp.ge.f32.partialorder %v1575_v54, %v702_v15  ;;  %v782_v54 = vld [vmem:[%s1731_s2 + $0x5] sm:$0x1]  ;;  %v767_v15 = vmul.f32 %v1589_v7, %v759_v12 }
 0x716   : > { %v773_v19 = vsel %vm725_vm0, %v765_v46, 0.0  ;;  %v783_v46 = vld [vmem:[%s1731_s2 + $0x6] sm:$0x1]  ;;  %vm1018_vm0 = vcmp.eq.s32.totalorder %v1461_v1, 1 }
 0x717   : > { %v789_v20 = vmul.f32 %v781_v16, %v773_v19 }
 0x719   : > { %1144 = vmatmul.msk.f32.vlgmr.msrb.gmra.mxu2 %vm801_vm14, %v789_v20  ;;  %v998_v22 = vsel %vm584_vm12, %v789_v20, 0.0 }
 0x71a   : > { %999 = vadd.xlane.f32.xlu0 %v998_v22  ;;  %v706_v24 = vpop.permute.xlu2 %705 }
 0x71b   : > { %v708_v25 = vperm.slane %v706_v24, 0 }
 0x71d   : > { %vm726_vm3 = vcmp.ge.f32.partialorder %v1583_v3, %v708_v25 }
 0x71e   : > { %v774_v32 = vsel %vm726_vm3, %v766_v28, 0.0 }
 0x71f   : > { %v790_v33 = vmul.f32 %v782_v54, %v774_v32 }
 0x721   : > { %v1001_v38 = vsel %vm584_vm12, %v790_v33, 0.0 }
 0x722   : > { %1002 = vadd.xlane.f32.xlu1 %v1001_v38  ;;  %v718_v43 = vpop.permute.xlu2 %717 }
 0x723   : > { %v720_v3 = vperm.slane %v718_v43, 0 }
 0x725   : > { %vm728_vm5 = vcmp.ge.f32.partialorder %v1587_v6, %v720_v3  ;;  %v740_v6 = vmul.f32 %v1224_v58, %v1627_v34  ;;  %v780_v34 = vld [vmem:[%s1731_s2 + $0x3] sm:$0x1] }
 0x726   : > { %v776_v57 = vsel %vm728_vm5, %v768_v52, 0.0 }
 0x727   : > { %v748_v62 = vsub.f32 2.0, %v740_v6 }
 0x729   : > { %v756_v2 = vmul.f32 %v1224_v58, %v748_v62 }
 0x72b   : > { %v682_v47 = vpop.permute.xlu0 %681  ;;  %v764_v8 = vmul.f32 %v1595_v10, %v756_v2 }
 0x72c   : > { %v684_v48 = vperm.slane %v682_v47, 0 }
 0x72e   : > { %vm722_vm4 = vcmp.ge.f32.partialorder %v1577_v56, %v684_v48  ;;  %v784_v56 = vld [vmem:[%s1731_s2 + $0x7] sm:$0x1] }
 0x72f   : > { %v770_v30 = vsel %vm722_vm4, %v762_v23, 0.0  ;;  %v792_v59 = vmul.f32 %v784_v56, %v776_v57 }
 0x730   : > { %v786_v51 = vmul.f32 %v778_v50, %v770_v30 }
 0x731   : > { %v1007_v61 = vsel %vm584_vm12, %v792_v59, 0.0 }
 0x732   : > { %1141 = vmatmul.msk.f32.vlgmr.msra.gmra.mxu3 %vm801_vm14, %v786_v51  ;;  %v989_v27 = vsel %vm584_vm12, %v786_v51, 0.0 }
 0x733   : > { %990 = vadd.xlane.f32.xlu0 %v989_v27  ;;  %v239_v55 = vpop.permute.xlu0 %238 }
 0x734   : > { %241 = vst.msk [vmem:[#allocation4] sm:$0xff] %vm109_vm1, %v239_v55 }
 0x73a   : > { %1145 = vmatmul.msk.f32.vlgmr.msrb.gmra.mxu3 %vm801_vm14, %v790_v33 }
 0x73b   : > { %1008 = vadd.xlane.f32.xlu0 %v1007_v61  ;;  %1082 = vperm.xlu1 %1176, %v1150_v60  }
 0x742   : > { %v694_v4 = vpop.permute.xlu1 %693 }
 0x743   : > { %v696_v5 = vperm.slane %v694_v4, 0 }
 0x745   : > { %vm724_vm6 = vcmp.ge.f32.partialorder %v1595_v10, %v696_v5 }
 0x746   : > { %v772_v9 = vsel %vm724_vm6, %v764_v8, 0.0 }
 0x747   : > { %v788_v11 = vmul.f32 %v780_v34, %v772_v9 }
 0x749   : > { %1143 = vmatmul.msk.f32.vlgmr.msra.gmra.mxu1 %vm801_vm14, %v788_v11  ;;  %v995_v13 = vsel %vm584_vm12, %v788_v11, 0.0 }
 0x74a   : > { %996 = vadd.xlane.f32.xlu2 %v995_v13  ;;  %v712_v36 = vpop.permute.xlu1 %711 }
 0x74b   : > { %v714_v14 = vperm.slane %v712_v36, 0 }
 0x74d   : > { %vm727_vm7 = vcmp.ge.f32.partialorder %v1589_v7, %v714_v14  ;;  %v1375_v7 = vmov 0.0  }
 0x74e   : > { %v775_v16 = vsel %vm727_vm7, %v767_v15, 0.0 }
 0x74f   : > { %v791_v10 = vmul.f32 %v783_v46, %v775_v16 }
 0x751   : > { %1146 = vmatmul.msk.f32.vlgmr.msra.gmra.mxu0 %vm801_vm14, %v791_v10  ;;  %1147 = vmatmul.msk.f32.vlgmr.msrb.gmra.mxu1 %vm801_vm14, %v792_v59  ;;  %v1004_v17 = vsel %vm584_vm12, %v791_v10, 0.0  ;;  %vm1041_vm12 = vcmask 1044484   ;;  %vm1045_vm14 = vcmask 1046534  }
 0x752   : > { %1005 = vadd.xlane.f32.xlu2 %v1004_v17  ;;  %v329_v18 = vpop.permute.xlu1 %328 }
 0x753   : > { %331 = vst.msk [vmem:[#allocation5] sm:$0xff] %vm109_vm1, %v329_v18 }
 0x76a   : > { %333 = vrot.lane.b32.xlu2 %v1502_v31, %s1371_s21  ;;  %s1075_s21 = scalar_lea.vmem [#allocation14], %s1148_s0 }
 0x781   : > { %v994_v19 = vpop.xlane.xlu1 %993 }
 0x782   : > { %v1012_v38 = vsub.f32 1.0, %v994_v19 }
 0x784   : > { %v1021_v43 = vperm.slane %v1012_v38, 0 }
 0x785   : > { %v988_v25 = vpop.xlane.xlu2 %987 }
 0x786   : > { %v1010_v29 = vsub.f32 1.0, %v988_v25 }
 0x788   : > { %v1019_v31 = vperm.slane %v1010_v29, 0 }
 0x78a   : > { %v868_v40 = vpop.f32.mrf.mxu0 }
 0x78b   : > { %v1060_v48 = vrot.slane %v868_v40, 6 }
 0x78d   : > { %v1000_v24 = vpop.xlane.xlu0 %999 }
 0x78e   : > { %v1014_v44 = vsub.f32 1.0, %v1000_v24 }
 0x790   : > { %v1023_v27 = vperm.slane %v1014_v44, 0 }
 0x794   : > { %v822_v32 = vpop.f32.mrf.mxu2 }
 0x795   : > { %v1003_v20 = vpop.xlane.xlu1 %1002 }
 0x796   : > { %v1015_v30 = vsub.f32 1.0, %v1003_v20 }
 0x798   : > { %v1024_v61 = vperm.slane %v1015_v30, 0 }
 0x79c   : > { %v914_v51 = vpop.f32.mrf.mxu2 }
 0x79d   : > { %v1064_v58 = vrot.slane %v914_v51, 4 }
 0x7a6   : > { %v991_v26 = vpop.xlane.xlu0 %990 }
 0x7a7   : > { %v1011_v28 = vsub.f32 1.0, %v991_v26 }
 0x7a9   : > { %v1020_v35 = vperm.slane %v1011_v28, 0 }
 0x7ab   : > { %v1036_v41 = vsel %vm1035_vm9, %v1020_v35, %v1019_v31 }
 0x7ac   : > { %v1038_v49 = vsel %vm1037_vm10, %v1021_v43, %v1036_v41 }
 0x7ad   : > { %v1083_v21 = vpop.permute.xlu1 %1082 }
 0x7ae   : > { %vm1084_vm8 = vcmp.eq.s32.totalorder %v1461_v1, %v1083_v21  ;;  %v1009_v55 = vpop.xlane.xlu0 %1008 }
 0x7af   : > { %v1151_v22 = vsel %vm1084_vm8, 1.0, %v1375_v7  ;;  %v1017_v62 = vsub.f32 1.0, %v1009_v55 }
 0x7b0   : > { %1087 = vst [vmem:[#allocation2] sm:$0xff] %v1151_v22 }
 0x7b1   : > { %v1026_v11 = vperm.slane %v1017_v62, 0 }
 0x7b5   : > { %v845_v33 = vpop.f32.mrf.mxu3 }
 0x7b6   : > { %v1058_v39 = vrot.slane %v845_v33, 7 }
 0x7b8   : > { %v1059_v47 = vsel %vm1035_vm9, %v1058_v39, %v822_v32 }
 0x7b9   : > { %v1061_v57 = vsel %vm1037_vm10, %v1060_v48, %v1059_v47 }
 0x7bd   : > { %v997_v54 = vpop.xlane.xlu2 %996  ;;  %v937_v59 = vpop.f32.mrf.mxu3 }
 0x7be   : > { %v1013_v53 = vsub.f32 1.0, %v997_v54  ;;  %v1066_v2 = vrot.slane %v937_v59, 3 }
 0x7c0   : > { %v1022_v42 = vperm.slane %v1013_v53, 0 }
 0x7c2   : > { %v1040_v52 = vsel %vm1039_vm11, %v1022_v42, %v1038_v49 }
 0x7c3   : > { %v1042_v6 = vsel %vm1041_vm12, %v1023_v27, %v1040_v52 }
 0x7c4   : > { %v1044_v4 = vsel %vm1043_vm13, %v1024_v61, %v1042_v6 }
 0x7c5   : > { %v1006_v45 = vpop.xlane.xlu2 %1005 }
 0x7c6   : > { %v891_v3 = vpop.f32.mrf.mxu1  ;;  %v1016_v23 = vsub.f32 1.0, %v1006_v45 }
 0x7c7   : > { %v1062_v50 = vrot.slane %v891_v3, 5 }
 0x7c8   : > { %v1025_v60 = vperm.slane %v1016_v23, 0 }
 0x7c9   : > { %v1063_v56 = vsel %vm1039_vm11, %v1062_v50, %v1061_v57 }
 0x7ca   : > { %v1065_v63 = vsel %vm1041_vm12, %v1064_v58, %v1063_v56  ;;  %v1046_v8 = vsel %vm1045_vm14, %v1025_v60, %v1044_v4 }
 0x7cb   : > { %v1067_v12 = vsel %vm1043_vm13, %v1066_v2, %v1065_v63  ;;  %v1048_v36 = vsel %vm1047_vm15, %v1026_v11, %v1046_v8 }
 0x7cd   : > { %v334_v0 = vpop.permute.xlu2 %333 }
 0x7ce   : > { %336 = vst.msk [vmem:[#allocation3] sm:$0xff] %vm116_vm2, %v334_v0  ;;  %v960_v5 = vpop.f32.mrf.mxu0  ;;  %v983_v37 = vpop.f32.mrf.mxu1 }
 0x7cf   : > { %v1068_v34 = vrot.slane %v960_v5, 2  ;;  %v1070_v9 = vrot.slane %v983_v37, 1 }
 0x7d0   :  { %124 = sbr.rel (!%p122_p0) target bundleno = 136 (0x88), region = 89 }
 0x7d1   : > { %v1069_v13 = vsel %vm1045_vm14, %v1068_v34, %v1067_v12 }
 0x7d2   : > { %v1071_v14 = vsel %vm1047_vm15, %v1070_v9, %v1069_v13 }
 0x7d3   : > { %v1073_v15 = vsel %vm1018_vm0, %v1048_v36, %v1071_v14 }
 0x7d4   : > { %1076 = vst [vmem:[%s1075_s21] sm:$0xff] %v1073_v15 }
 0x7d5   :  { %1100 = dma.vmem_to_hbm [thread:$0]  %s1093_s22, 640, %s1095_s9, [#allocation8], %s1364_s25, %s1364_s25, %s1365_s26  }
 0x7d6   :  { %1357 = dma.done.wait [#allocation8], 640  }
 0x7d7   :  { %1358 = vsyncadd [#allocation8], 4294966656 }
 0x7d8   :  { %1105 = vsyncpa [#allocation7], 1 }
 0x7d9   :  { %1106 = vsyncpa [#allocation10], 1 }
 0x7da   :  { %1107 = vsyncpa [#allocation13], 1 }
 0x7db   :  { %1108 = vsyncpa [#allocation8], 1 }

</bundles_post_ra>
